<compile_context>
chip_gen: v5e
topology: v5e:2x2
jax: 0.10.0
libtpu: 0.0.40
codegen_flags: <defaults>
</compile_context>

<pallas_src>
import functools

import jax
import jax.numpy as jnp
from jax import lax
from jax.experimental import pallas as pl
from jax.experimental.pallas import tpu as pltpu


def _mm(a, b):
    """Plain (i,k)x(k,j) matmul on the MXU with f32 accumulation."""
    return lax.dot_general(
        a, b, (((1,), (0,)), ((), ())), preferred_element_type=jnp.float32)


def _opt_solve_kernel(x_ref, w_ref, y_ref, *, alpha, lr, iters):
    """In-kernel solver for the unconstrained declarative problem.

    Mathematically identical to `iters` steps of gradient descent (step `lr`)
    on 0.5*||y W^T - x||^2 + 0.5*alpha*||y||^2 starting from y0 = 0, but the
    linear recursion is collapsed to ~log2(iters) full-width MXU matmuls.
    """
    x = x_ref[...]  # (B, N) f32
    w = w_ref[...]  # (N, M) f32
    m = w.shape[1]

    if iters <= 0:
        y_ref[...] = jnp.zeros(y_ref.shape, dtype=y_ref.dtype)
        return

    # Identity built from 2-D iotas (TPU-friendly).
    row = lax.broadcasted_iota(jnp.int32, (m, m), 0)
    col = lax.broadcasted_iota(jnp.int32, (m, m), 1)
    eye = (row == col).astype(jnp.float32)

    # Hoisted loop-invariant algebra (two matmuls at kernel entry).
    wtw = lax.dot_general(
        w, w, (((0,), (0,)), ((), ())),
        preferred_element_type=jnp.float32)                  # W^T W  -> (M, M)
    g = (1.0 - lr * alpha) * eye - lr * wtw                  # (M, M), one VPU pass
    c = lr * _mm(x, w)                                       # lr * x W -> (B, M)
    # (c is computed before the doubling chain so it sits off the critical path.)

    # Geometric sum S = I + G + ... + G^(iters-1) via binary doubling:
    #   S_{2k}   = S_k + P_k S_k ,   P_{2k}   = P_k P_k
    #   S_{2k+1} = S_{2k} + P_{2k},  P_{2k+1} = P_{2k} G
    # Processed MSB->LSB over the bits of `iters`; fully unrolled at trace time.
    bits = bin(iters)[2:]          # first bit is always '1' for iters >= 1
    s = eye                        # S_1
    p = g                          # G^1
    n_rest = len(bits) - 1
    for i, bit in enumerate(bits[1:]):
        last = (i == n_rest - 1)
        s = s + _mm(p, s)          # S_{2k}
        if bit == "1":
            p = _mm(p, p)          # P_{2k}
            s = s + p              # S_{2k+1}
            if not last:
                p = _mm(p, g)      # P_{2k+1}
        elif not last:
            p = _mm(p, p)          # P_{2k}  (skip on last step: P no longer needed)

    y = _mm(c, s)                  # (B, M)
    y_ref[...] = y.astype(y_ref.dtype)


class UnconstrainedProblem:
    """Concrete unconstrained declarative node (ridge-regularized least squares)."""

    def __init__(self, w, alpha=0.5, iters=100):
        self.w = jnp.asarray(w, jnp.float32)          # (N, M)
        self.alpha = float(alpha)
        self.iters = int(iters)
        # Lipschitz constant of the gradient -> step size (computed once, host-side).
        smax = float(jnp.linalg.norm(self.w, 2))
        self.lr = 1.0 / (smax * smax + self.alpha)
        self._solvers = {}                            # cache: (B, N) -> jitted callable

    def _build_solver(self, B, N):
        N2, M = self.w.shape
        assert N == N2, f"feature dim mismatch: x has {N}, W has {N2}"
        kernel = functools.partial(
            _opt_solve_kernel, alpha=self.alpha, lr=self.lr, iters=self.iters)
        # Single kernel invocation (no grid): whole operands resident in VMEM
        # (x: B*N*4 + W: N*M*4 + y: B*M*4 bytes -- tiny on all generations).
        # TODO(synk): for large B on v7x, add a "parallel" batch grid axis to
        # use the second TensorCore; unnecessary at B=8.
        call = pl.pallas_call(
            kernel,
            out_shape=jax.ShapeDtypeStruct((B, M), jnp.float32),
            in_specs=[
                pl.BlockSpec(memory_space=pltpu.MemorySpace.VMEM),
                pl.BlockSpec(memory_space=pltpu.MemorySpace.VMEM),
            ],
            out_specs=pl.BlockSpec(memory_space=pltpu.MemorySpace.VMEM),
        )
        return jax.jit(lambda x, w: call(x, w))

    def solve(self, x):
        """x: (B, N) float32  ->  y: (B, M) float32 (argmin of the objective)."""
        x = jnp.asarray(x, jnp.float32)
        B, N = x.shape
        key = (B, N)
        if key not in self._solvers:
            self._solvers[key] = self._build_solver(B, N)
        y = self._solvers[key](x, self.w)
        # ctx is None for this closed/iterative solve (mirrors DDN solve_ctx).
        return y, None


class OptLayer:
    """JAX/Pallas equivalent of the PyTorch OptLayer forward pass.

    forward(*inputs) -> problem.solve(*inputs)[0]  (a fresh output array).
    # TODO(synk): the custom backward (implicit-function-theorem gradient of
    # OptFunction.backward) is not reproduced; only the forward pass is.
    """

    def __init__(self, problem):
        self.problem = problem

    def __call__(self, *inputs):
        output, _solve_ctx = self.problem.solve(*inputs)
        return output  # functional JAX: already a fresh array (clone semantics)


if __name__ == "__main__":
    # Deterministic parameters & inputs.
    key = jax.random.PRNGKey(0)
    kx, kw = jax.random.split(key)

    B, N, M = 8, 256, 128
    x = jax.random.normal(kx, (B, N), dtype=jnp.float32)
    W = 0.05 * jax.random.normal(kw, (N, M), dtype=jnp.float32)

    problem = UnconstrainedProblem(W, alpha=0.5, iters=100)
    layer = OptLayer(problem)

    y = layer(x)
    y = jax.block_until_ready(y)

    # Reference: closed-form solution  y* = x W (W^T W + alpha I)^{-1}
    A = W.T @ W + problem.alpha * jnp.eye(M, dtype=jnp.float32)
    y_ref = jnp.linalg.solve(A, (x @ W).T).T

    assert y.shape == (B, M) and y.dtype == jnp.float32
    assert bool(jnp.max(jnp.abs(y - y_ref)) < 1e-2), "solver did not converge"

    print("KERNEL_OK")
</pallas_src>

<mosaic_0001>
module attributes {stable_mosaic.version = 11 : i64} {
  func.func @_opt_solve_kernel(%arg0: memref<8x256xf32, #tpu.memory_space<vmem>>, %arg1: memref<256x128xf32, #tpu.memory_space<vmem>>, %arg2: memref<8x128xf32, #tpu.memory_space<vmem>>) attributes {dimension_semantics = [], scalar_prefetch = 0 : i64, scratch_operands = 0 : i64, tpu.core_type = #tpu.core_type<tc>} {
    %c0 = arith.constant 0 : index
    %c0_0 = arith.constant 0 : index
    %0 = vector.load %arg0[%c0, %c0_0] : memref<8x256xf32, #tpu.memory_space<vmem>>, vector<8x256xf32>
    %c0_1 = arith.constant 0 : index
    %c0_2 = arith.constant 0 : index
    %1 = vector.load %arg1[%c0_1, %c0_2] : memref<256x128xf32, #tpu.memory_space<vmem>>, vector<256x128xf32>
    %2 = tpu.iota {dimensions = array<i32: 0>} : vector<128x128xi32>
    %3 = tpu.iota {dimensions = array<i32: 1>} : vector<128x128xi32>
    %4 = arith.cmpi eq, %2, %3 : vector<128x128xi32>
    %5 = arith.extui %4 : vector<128x128xi1> to vector<128x128xi32>
    %6 = arith.sitofp %5 : vector<128x128xi32> to vector<128x128xf32>
    %cst = arith.constant dense<0.000000e+00> : vector<128x128xf32>
    %7 = tpu.matmul %1, %1, %cst {dimension_numbers = #tpu.dot_dimension_numbers<[0], [0], [1], [1], [0, 1, 1, 1], [], []>} : vector<256x128xf32>, vector<256x128xf32>, vector<128x128xf32> -> vector<128x128xf32>
    %cst_3 = arith.constant 0.785447061 : f32
    %8 = vector.broadcast %cst_3 : f32 to vector<128x128xf32>
    %9 = arith.mulf %8, %6 : vector<128x128xf32>
    %cst_4 = arith.constant 0.429105937 : f32
    %10 = vector.broadcast %cst_4 : f32 to vector<128x128xf32>
    %11 = arith.mulf %10, %7 : vector<128x128xf32>
    %12 = arith.subf %9, %11 : vector<128x128xf32>
    %cst_5 = arith.constant dense<0.000000e+00> : vector<8x128xf32>
    %13 = tpu.matmul %0, %1, %cst_5 {dimension_numbers = #tpu.dot_dimension_numbers<[1], [0], [0], [1], [0, 0, 1, 1], [], []>} : vector<8x256xf32>, vector<256x128xf32>, vector<8x128xf32> -> vector<8x128xf32>
    %cst_6 = arith.constant 0.429105937 : f32
    %14 = vector.broadcast %cst_6 : f32 to vector<8x128xf32>
    %15 = arith.mulf %14, %13 : vector<8x128xf32>
    %cst_7 = arith.constant dense<0.000000e+00> : vector<128x128xf32>
    %16 = tpu.matmul %12, %6, %cst_7 {dimension_numbers = #tpu.dot_dimension_numbers<[1], [0], [0], [1], [0, 0, 1, 1], [], []>} : vector<128x128xf32>, vector<128x128xf32>, vector<128x128xf32> -> vector<128x128xf32>
    %17 = arith.addf %6, %16 : vector<128x128xf32>
    %cst_8 = arith.constant dense<0.000000e+00> : vector<128x128xf32>
    %18 = tpu.matmul %12, %12, %cst_8 {dimension_numbers = #tpu.dot_dimension_numbers<[1], [0], [0], [1], [0, 0, 1, 1], [], []>} : vector<128x128xf32>, vector<128x128xf32>, vector<128x128xf32> -> vector<128x128xf32>
    %19 = arith.addf %17, %18 : vector<128x128xf32>
    %cst_9 = arith.constant dense<0.000000e+00> : vector<128x128xf32>
    %20 = tpu.matmul %18, %12, %cst_9 {dimension_numbers = #tpu.dot_dimension_numbers<[1], [0], [0], [1], [0, 0, 1, 1], [], []>} : vector<128x128xf32>, vector<128x128xf32>, vector<128x128xf32> -> vector<128x128xf32>
    %cst_10 = arith.constant dense<0.000000e+00> : vector<128x128xf32>
    %21 = tpu.matmul %20, %19, %cst_10 {dimension_numbers = #tpu.dot_dimension_numbers<[1], [0], [0], [1], [0, 0, 1, 1], [], []>} : vector<128x128xf32>, vector<128x128xf32>, vector<128x128xf32> -> vector<128x128xf32>
    %22 = arith.addf %19, %21 : vector<128x128xf32>
    %cst_11 = arith.constant dense<0.000000e+00> : vector<128x128xf32>
    %23 = tpu.matmul %20, %20, %cst_11 {dimension_numbers = #tpu.dot_dimension_numbers<[1], [0], [0], [1], [0, 0, 1, 1], [], []>} : vector<128x128xf32>, vector<128x128xf32>, vector<128x128xf32> -> vector<128x128xf32>
    %cst_12 = arith.constant dense<0.000000e+00> : vector<128x128xf32>
    %24 = tpu.matmul %23, %22, %cst_12 {dimension_numbers = #tpu.dot_dimension_numbers<[1], [0], [0], [1], [0, 0, 1, 1], [], []>} : vector<128x128xf32>, vector<128x128xf32>, vector<128x128xf32> -> vector<128x128xf32>
    %25 = arith.addf %22, %24 : vector<128x128xf32>
    %cst_13 = arith.constant dense<0.000000e+00> : vector<128x128xf32>
    %26 = tpu.matmul %23, %23, %cst_13 {dimension_numbers = #tpu.dot_dimension_numbers<[1], [0], [0], [1], [0, 0, 1, 1], [], []>} : vector<128x128xf32>, vector<128x128xf32>, vector<128x128xf32> -> vector<128x128xf32>
    %cst_14 = arith.constant dense<0.000000e+00> : vector<128x128xf32>
    %27 = tpu.matmul %26, %25, %cst_14 {dimension_numbers = #tpu.dot_dimension_numbers<[1], [0], [0], [1], [0, 0, 1, 1], [], []>} : vector<128x128xf32>, vector<128x128xf32>, vector<128x128xf32> -> vector<128x128xf32>
    %28 = arith.addf %25, %27 : vector<128x128xf32>
    %cst_15 = arith.constant dense<0.000000e+00> : vector<128x128xf32>
    %29 = tpu.matmul %26, %26, %cst_15 {dimension_numbers = #tpu.dot_dimension_numbers<[1], [0], [0], [1], [0, 0, 1, 1], [], []>} : vector<128x128xf32>, vector<128x128xf32>, vector<128x128xf32> -> vector<128x128xf32>
    %30 = arith.addf %28, %29 : vector<128x128xf32>
    %cst_16 = arith.constant dense<0.000000e+00> : vector<128x128xf32>
    %31 = tpu.matmul %29, %12, %cst_16 {dimension_numbers = #tpu.dot_dimension_numbers<[1], [0], [0], [1], [0, 0, 1, 1], [], []>} : vector<128x128xf32>, vector<128x128xf32>, vector<128x128xf32> -> vector<128x128xf32>
    %cst_17 = arith.constant dense<0.000000e+00> : vector<128x128xf32>
    %32 = tpu.matmul %31, %30, %cst_17 {dimension_numbers = #tpu.dot_dimension_numbers<[1], [0], [0], [1], [0, 0, 1, 1], [], []>} : vector<128x128xf32>, vector<128x128xf32>, vector<128x128xf32> -> vector<128x128xf32>
    %33 = arith.addf %30, %32 : vector<128x128xf32>
    %cst_18 = arith.constant dense<0.000000e+00> : vector<128x128xf32>
    %34 = tpu.matmul %31, %31, %cst_18 {dimension_numbers = #tpu.dot_dimension_numbers<[1], [0], [0], [1], [0, 0, 1, 1], [], []>} : vector<128x128xf32>, vector<128x128xf32>, vector<128x128xf32> -> vector<128x128xf32>
    %cst_19 = arith.constant dense<0.000000e+00> : vector<128x128xf32>
    %35 = tpu.matmul %34, %33, %cst_19 {dimension_numbers = #tpu.dot_dimension_numbers<[1], [0], [0], [1], [0, 0, 1, 1], [], []>} : vector<128x128xf32>, vector<128x128xf32>, vector<128x128xf32> -> vector<128x128xf32>
    %36 = arith.addf %33, %35 : vector<128x128xf32>
    %cst_20 = arith.constant dense<0.000000e+00> : vector<8x128xf32>
    %37 = tpu.matmul %15, %36, %cst_20 {dimension_numbers = #tpu.dot_dimension_numbers<[1], [0], [0], [1], [0, 0, 1, 1], [], []>} : vector<8x128xf32>, vector<128x128xf32>, vector<8x128xf32> -> vector<8x128xf32>
    %c0_21 = arith.constant 0 : index
    %c0_22 = arith.constant 0 : index
    %38 = vector.load %arg2[%c0_21, %c0_22] : memref<8x128xf32, #tpu.memory_space<vmem>>, vector<8x128xf32>
    tpu.vector_store %arg2[%c0_21, %c0_22], %37 {strides = array<i32>} : memref<8x128xf32, #tpu.memory_space<vmem>>, vector<8x128xf32>,
    return
  }
}

</mosaic_0001>

<bundles_post_ra>
// kernel: _lambda_.1
= control target key start
LH: loop header
LB: loop body
LE: loop exit
PB: predicated region body
PF: predicated region fallthrough
CT: control target
= control target key end

     0   :  { %7 = vsyncpa [#allocation3], 0  ;;  %s2624_s0 = inlined_call_operand.hbm [shape: f32[8,256], index: 0, kind: input, shape index: {}]   ;;  %s2625_s1 = inlined_call_operand.hbm [shape: f32[256,128], index: 1, kind: input, shape index: {}]   ;;  %s2626_s2 = inlined_call_operand.hbm [shape: f32[8,128], index: 2, kind: output, shape index: {}]  }
   0x1   :  { %8 = vsyncpa [#allocation6], 0 }
   0x2   :  { %9 = vsyncpa [#allocation4], 0  ;;  %s15_s11 = sshll.u32 %s2624_s0, 4  ;;  %s1689_s12 = smov [#allocation2]   ;;  %s16_s11 = int_to_ptr.hbm [resolvable:$true] %s15_s11 }
   0x3   :  { %s17_s13 = sshll.u32 %s1689_s12, 4  ;;  %s25_s16 = sshll.u32 %s2625_s1, 4  ;;  %s18_s13 = int_to_ptr.vmem [resolvable:$true] %s17_s13  ;;  %s26_s16 = int_to_ptr.hbm [resolvable:$true] %s25_s16 }
   0x4   :  { %20 = dma.hbm_to_vmem [thread:$0]  %s16_s11, 256, %s18_s13, [#allocation3]  }
   0x5   :  { %s1690_s17 = smov [#allocation5]   ;;  %s1691_s19 = smov 128  }
   0x6   :  { %s27_s18 = sshll.u32 %s1690_s17, 4  ;;  %s1692_s20 = smov 8   ;;  %s28_s18 = int_to_ptr.vmem [resolvable:$true] %s27_s18 }
   0x7   :  { %33 = dma.hbm_to_vmem [thread:$0]  %s26_s16, 4096, %s28_s18, [#allocation6], %s1691_s19, %s1691_s19, %s1692_s20  }
   0x8   :  { %1683 = dma.done.wait [#allocation3], 256  }
   0x9   :  { %1684 = vsyncadd [#allocation3], 4294967040 }
   0xa   :  { %1685 = dma.done.wait [#allocation6], 4096  }
   0xb   :  { %1686 = vsyncadd [#allocation6], 4294963200  ;;  %v1717_v0 = vld [vmem:[#allocation5] sm:$0xff]  ;;  %v1723_v3 = vld [vmem:[#allocation5 + $0x8] sm:$0xff]  ;;  %s1695_s0 = smov [#allocation7]   ;;  %s1427_s23 = sshll.u32 %s2626_s2, 4  ;;  %s1428_s23 = int_to_ptr.hbm [resolvable:$true] %s1427_s23 }
   0xc   :  { %v1719_v1 = vld [vmem:[#allocation5 + $0x80] sm:$0xff]  ;;  %v1725_v4 = vld [vmem:[#allocation5 + $0x88] sm:$0xff]  ;;  %v1729_v6 = vld [vmem:[#allocation5 + $0x10] sm:$0xff]  ;;  %s1425_s1 = sshll.u32 %s1695_s0, 4  ;;  %s1426_s1 = int_to_ptr.vmem [resolvable:$true] %s1425_s1 }
   0xd   :  { %v1499_v2 = vpack.i.bf16 %v1719_v1, %v1717_v0  ;;  %v1501_v5 = vpack.i.bf16 %v1725_v4, %v1723_v3  ;;  %v1731_v7 = vld [vmem:[#allocation5 + $0x90] sm:$0xff]  ;;  %v1735_v9 = vld [vmem:[#allocation5 + $0x18] sm:$0xff]  ;;  %v1741_v12 = vld [vmem:[#allocation5 + $0x20] sm:$0xff] }
   0xe   :  { %v1503_v8 = vpack.i.bf16 %v1731_v7, %v1729_v6  ;;  %v1737_v10 = vld [vmem:[#allocation5 + $0x98] sm:$0xff]  ;;  %v1743_v13 = vld [vmem:[#allocation5 + $0xa0] sm:$0xff]  ;;  %v1747_v15 = vld [vmem:[#allocation5 + $0x28] sm:$0xff] }
   0xf   :  { %1500 = vxpose.xlu0.b32.start [1/16] %v1499_v2, 128  ;;  %v1505_v11 = vpack.i.bf16 %v1737_v10, %v1735_v9  ;;  %v1507_v14 = vpack.i.bf16 %v1743_v13, %v1741_v12  ;;  %v1749_v16 = vld [vmem:[#allocation5 + $0xa8] sm:$0xff]  ;;  %v1753_v18 = vld [vmem:[#allocation5 + $0x30] sm:$0xff]  ;;  %v51_v21 = vld [vmem:[#allocation5 + $0x38] sm:$0xff] }
  0x10   :  { %v1509_v17 = vpack.i.bf16 %v1749_v16, %v1747_v15  ;;  %v1755_v19 = vld [vmem:[#allocation5 + $0xb0] sm:$0xff]  ;;  %v1759_v22 = vld [vmem:[#allocation5 + $0xb8] sm:$0xff]  ;;  %v52_v24 = vld [vmem:[#allocation5 + $0x40] sm:$0xff] }
  0x11   :  { %v1511_v20 = vpack.i.bf16 %v1755_v19, %v1753_v18  ;;  %v1513_v23 = vpack.i.bf16 %v1759_v22, %v51_v21  ;;  %v68_v25 = vld [vmem:[#allocation5 + $0xc0] sm:$0xff]  ;;  %v53_v27 = vld [vmem:[#allocation5 + $0x48] sm:$0xff]  ;;  %v54_v30 = vld [vmem:[#allocation5 + $0x50] sm:$0xff] }
  0x12   :  { %v1515_v26 = vpack.i.bf16 %v68_v25, %v52_v24  ;;  %v69_v28 = vld [vmem:[#allocation5 + $0xc8] sm:$0xff]  ;;  %v70_v31 = vld [vmem:[#allocation5 + $0xd0] sm:$0xff]  ;;  %v1762_v33 = vld [vmem:[#allocation5 + $0x78] sm:$0xff] }
  0x13   :  { %v1517_v29 = vpack.i.bf16 %v69_v28, %v53_v27  ;;  %v1519_v32 = vpack.i.bf16 %v70_v31, %v54_v30  ;;  %v1764_v34 = vld [vmem:[#allocation5 + $0xf8] sm:$0xff]  ;;  %207 = vmatpush.msra.mxu0 %v1762_v33  ;;  %v1768_v37 = vld [vmem:[#allocation5 + $0x70] sm:$0xff]  ;;  %385 = vmatpush.msra.mxu2 %v1762_v33  ;;  %v57_v40 = vld [vmem:[#allocation5 + $0x68] sm:$0xff] }
  0x14   :  { %v55_v35 = vld [vmem:[#allocation5 + $0x58] sm:$0xff]  ;;  %272 = vmatpush.msra.mxu1 %v1764_v34  ;;  %v1770_v38 = vld [vmem:[#allocation5 + $0xf0] sm:$0xff]  ;;  %405 = vmatpush.msra.mxu3 %v1764_v34  ;;  %v73_v41 = vld [vmem:[#allocation5 + $0xe8] sm:$0xff]  ;;  %v1529_v47 = vpack.i.bf16 %v1764_v34, %v1762_v33 }
  0x15   :  { %v71_v36 = vld [vmem:[#allocation5 + $0xd8] sm:$0xff]  ;;  %208 = vmatpush.msra.mxu0 %v1768_v37  ;;  %386 = vmatpush.msra.mxu2 %v1768_v37  ;;  %v56_v42 = vld [vmem:[#allocation5 + $0x60] sm:$0xff]  ;;  %v1525_v45 = vpack.i.bf16 %v73_v41, %v57_v40  ;;  %v1527_v46 = vpack.i.bf16 %v1770_v38, %v1768_v37 }
  0x16   :  { %273 = vmatpush.msra.mxu1 %v1770_v38  ;;  %v1521_v39 = vpack.i.bf16 %v71_v36, %v55_v35  ;;  %406 = vmatpush.msra.mxu3 %v1770_v38  ;;  %v72_v43 = vld [vmem:[#allocation5 + $0xe0] sm:$0xff] }
  0x17   :  { %1502 = vxpose.xlu0.b32.cont [2/16] %v1501_v5, 128  ;;  %209 = vmatpush.msra.mxu0 %v57_v40  ;;  %v1523_v44 = vpack.i.bf16 %v72_v43, %v56_v42 }
  0x18   :  { %274 = vmatpush.msra.mxu1 %v73_v41  ;;  %387 = vmatpush.msra.mxu2 %v57_v40 }
  0x19   :  { %407 = vmatpush.msra.mxu3 %v73_v41  ;;  %210 = vmatpush.msra.mxu0 %v56_v42 }
  0x1a   :  { %275 = vmatpush.msra.mxu1 %v72_v43  ;;  %388 = vmatpush.msra.mxu2 %v56_v42 }
  0x1b   :  { %211 = vmatpush.msra.mxu0 %v55_v35  ;;  %408 = vmatpush.msra.mxu3 %v72_v43 }
  0x1c   :  { %276 = vmatpush.msra.mxu1 %v71_v36  ;;  %389 = vmatpush.msra.mxu2 %v55_v35 }
  0x1d   :  { %212 = vmatpush.msra.mxu0 %v54_v30  ;;  %409 = vmatpush.msra.mxu3 %v71_v36 }
  0x1e   :  { %277 = vmatpush.msra.mxu1 %v70_v31  ;;  %390 = vmatpush.msra.mxu2 %v54_v30 }
  0x1f   :  { %1504 = vxpose.xlu0.b32.cont [3/16] %v1503_v8, 128  ;;  %213 = vmatpush.msra.mxu0 %v53_v27 }
  0x20   :  { %278 = vmatpush.msra.mxu1 %v69_v28  ;;  %391 = vmatpush.msra.mxu2 %v53_v27 }
  0x21   :  { %410 = vmatpush.msra.mxu3 %v70_v31  ;;  %214 = vmatpush.msra.mxu0 %v52_v24 }
  0x22   :  { %279 = vmatpush.msra.mxu1 %v68_v25  ;;  %392 = vmatpush.msra.mxu2 %v52_v24 }
  0x23   :  { %215 = vmatpush.msra.mxu0 %v51_v21  ;;  %411 = vmatpush.msra.mxu3 %v69_v28 }
  0x24   :  { %280 = vmatpush.msra.mxu1 %v1759_v22  ;;  %393 = vmatpush.msra.mxu2 %v51_v21  ;;  %v1694_v21 = vmov 0.0  }
  0x25   :  { %216 = vmatpush.msra.mxu0 %v1753_v18  ;;  %412 = vmatpush.msra.mxu3 %v68_v25 }
  0x26   :  { %281 = vmatpush.msra.mxu1 %v1755_v19  ;;  %394 = vmatpush.msra.mxu2 %v1753_v18 }
  0x27   :  { %1506 = vxpose.xlu0.b32.cont [4/16] %v1505_v11, 128  ;;  %217 = vmatpush.msra.mxu0 %v1747_v15  ;;  %v76_v11 = vlaneseq }
  0x28   :  { %282 = vmatpush.msra.mxu1 %v1749_v16  ;;  %395 = vmatpush.msra.mxu2 %v1747_v15 }
  0x29   :  { %413 = vmatpush.msra.mxu3 %v1759_v22  ;;  %218 = vmatpush.msra.mxu0 %v1741_v12 }
  0x2a   :  { %283 = vmatpush.msra.mxu1 %v1743_v13  ;;  %396 = vmatpush.msra.mxu2 %v1741_v12  ;;  %v1812_v12 = vshrl.u32 %v76_v11, 7 }
  0x2b   :  { %219 = vmatpush.msra.mxu0 %v1735_v9  ;;  %414 = vmatpush.msra.mxu3 %v1755_v19  ;;  %v1693_v19 = vmov 1.0  }
  0x2c   :  { %284 = vmatpush.msra.mxu1 %v1737_v10  ;;  %397 = vmatpush.msra.mxu2 %v1735_v9  ;;  %v91_v15 = vadd.s32 112, %v1812_v12  ;;  %v89_v24 = vadd.s32 96, %v1812_v12  ;;  %v87_v28 = vadd.s32 80, %v1812_v12  ;;  %v86_v33 = vadd.s32 72, %v1812_v12 }
  0x2d   :  { %220 = vmatpush.msra.mxu0 %v1729_v6  ;;  %415 = vmatpush.msra.mxu3 %v1749_v16  ;;  %v85_v35 = vadd.s32 64, %v1812_v12  ;;  %v1866_v37 = vadd.s32 56, %v1812_v12  ;;  %v1887_v43 = vadd.s32 40, %v1812_v12 }
  0x2e   :  { %285 = vmatpush.msra.mxu1 %v1731_v7  ;;  %398 = vmatpush.msra.mxu2 %v1729_v6 }
  0x2f   :  { %1508 = vxpose.xlu0.b32.cont [5/16] %v1507_v14, 128  ;;  %221 = vmatpush.msra.mxu0 %v1723_v3  ;;  %v92_v14 = vadd.s32 120, %v1812_v12 }
  0x30   :  { %286 = vmatpush.msra.mxu1 %v1725_v4  ;;  %399 = vmatpush.msra.mxu2 %v1723_v3 }
  0x31   :  { %416 = vmatpush.msra.mxu3 %v1743_v13  ;;  %222 = vmatpush.msra.mxu0 %v1717_v0  ;;  %v1814_v13 = vand.u32 127, %v76_v11 }
  0x32   :  { %287 = vmatpush.msra.mxu1 %v1719_v1  ;;  %400 = vmatpush.msra.mxu2 %v1717_v0 }
  0x33   :  { %417 = vmatpush.msra.mxu3 %v1737_v10  ;;  %vm110_vm0 = vcmp.eq.s32.totalorder %v92_v14, %v1814_v13  ;;  %vm109_vm1 = vcmp.eq.s32.totalorder %v91_v15, %v1814_v13  ;;  %vm107_vm3 = vcmp.eq.s32.totalorder %v89_v24, %v1814_v13  ;;  %vm105_vm5 = vcmp.eq.s32.totalorder %v87_v28, %v1814_v13 }
  0x34   :  { %1454 = vmatpush.msk.msrb.mxu2 %vm110_vm0, %v1693_v19  ;;  %v1824_v22 = vsel %vm110_vm0, 1.0, %v1694_v21  ;;  %v1840_v27 = vsel %vm107_vm3, 1.0, %v1694_v21  ;;  %v1855_v34 = vsel %vm105_vm5, 1.0, %v1694_v21  ;;  %vm104_vm6 = vcmp.eq.s32.totalorder %v86_v33, %v1814_v13 }
  0x35   :  { %418 = vmatpush.msra.mxu3 %v1731_v7  ;;  %v1862_v36 = vsel %vm104_vm6, 1.0, %v1694_v21  ;;  %vm103_vm7 = vcmp.eq.s32.totalorder %v85_v35, %v1814_v13  ;;  %vm102_vm8 = vcmp.eq.s32.totalorder %v1866_v37, %v1814_v13  ;;  %vm100_vm10 = vcmp.eq.s32.totalorder %v1887_v43, %v1814_v13 }
  0x36   :  { %1455 = vmatpush.msk.msrb.mxu2 %vm109_vm1, %v1693_v19  ;;  %v1870_v38 = vsel %vm103_vm7, 1.0, %v1694_v21  ;;  %vm95_vm15 = vcmp.eq.s32.totalorder %v1812_v12, %v1814_v13 }
  0x37   :  { %1510 = vxpose.xlu0.b32.cont [6/16] %v1509_v17, 128  ;;  %419 = vmatpush.msra.mxu3 %v1725_v4 }
  0x39   :  { %420 = vmatpush.msra.mxu3 %v1719_v1 }
  0x3b   :  { %1470 = vmatpush.msk.msrb.mxu3 %vm110_vm0, %v1693_v19 }
  0x3d   :  { %1471 = vmatpush.msk.msrb.mxu3 %vm109_vm1, %v1693_v19 }
  0x3f   :  { %1512 = vxpose.xlu0.b32.cont [7/16] %v1511_v20, 128  ;;  %v90_v20 = vadd.s32 104, %v1812_v12 }
  0x41   :  { %vm108_vm2 = vcmp.eq.s32.totalorder %v90_v20, %v1814_v13 }
  0x42   :  { %v1834_v25 = vsel %vm108_vm2, 1.0, %v1694_v21  ;;  %1456 = vmatpush.msk.msrb.mxu2 %vm108_vm2, %v1693_v19  ;;  %1472 = vmatpush.msk.msrb.mxu3 %vm108_vm2, %v1693_v19 }
  0x44   :  { %1457 = vmatpush.msk.msrb.mxu2 %vm107_vm3, %v1693_v19  ;;  %1473 = vmatpush.msk.msrb.mxu3 %vm107_vm3, %v1693_v19 }
  0x47   :  { %1514 = vxpose.xlu0.b32.cont [8/16] %v1513_v23, 128  ;;  %v1827_v23 = vsel %vm109_vm1, 1.0, %v1694_v21 }
  0x4f   :  { %1516 = vxpose.xlu0.b32.cont [9/16] %v1515_v26, 128  ;;  %v88_v26 = vadd.s32 88, %v1812_v12 }
  0x51   :  { %vm106_vm4 = vcmp.eq.s32.totalorder %v88_v26, %v1814_v13 }
  0x52   :  { %1458 = vmatpush.msk.msrb.mxu2 %vm106_vm4, %v1693_v19  ;;  %1474 = vmatpush.msk.msrb.mxu3 %vm106_vm4, %v1693_v19 }
  0x54   :  { %1459 = vmatpush.msk.msrb.mxu2 %vm105_vm5, %v1693_v19  ;;  %1475 = vmatpush.msk.msrb.mxu3 %vm105_vm5, %v1693_v19 }
  0x56   :  { %1460 = vmatpush.msk.msrb.mxu2 %vm104_vm6, %v1693_v19  ;;  %1476 = vmatpush.msk.msrb.mxu3 %vm104_vm6, %v1693_v19 }
  0x57   :  { %1518 = vxpose.xlu0.b32.cont [10/16] %v1517_v29, 128 }
  0x58   :  { %1461 = vmatpush.msk.msrb.mxu2 %vm103_vm7, %v1693_v19  ;;  %1477 = vmatpush.msk.msrb.mxu3 %vm103_vm7, %v1693_v19 }
  0x5a   :  { %1462 = vmatpush.msk.msrb.mxu2 %vm102_vm8, %v1693_v19  ;;  %1478 = vmatpush.msk.msrb.mxu3 %vm102_vm8, %v1693_v19 }
  0x5f   :  { %1520 = vxpose.xlu0.b32.cont [11/16] %v1519_v32, 128  ;;  %v1848_v32 = vsel %vm106_vm4, 1.0, %v1694_v21 }
  0x67   :  { %1522 = vxpose.xlu0.b32.cont [12/16] %v1521_v39, 128  ;;  %v1876_v39 = vadd.s32 48, %v1812_v12 }
  0x69   :  { %vm101_vm9 = vcmp.eq.s32.totalorder %v1876_v39, %v1814_v13 }
  0x6a   :  { %1463 = vmatpush.msk.msrb.mxu2 %vm101_vm9, %v1693_v19  ;;  %1479 = vmatpush.msk.msrb.mxu3 %vm101_vm9, %v1693_v19 }
  0x6c   :  { %1464 = vmatpush.msk.msrb.mxu2 %vm100_vm10, %v1693_v19  ;;  %1480 = vmatpush.msk.msrb.mxu3 %vm100_vm10, %v1693_v19 }
  0x6f   :  { %1524 = vxpose.xlu0.b32.cont [13/16] %v1523_v44, 128  ;;  %v1894_v44 = vadd.s32 32, %v1812_v12 }
  0x71   :  { %vm99_vm11 = vcmp.eq.s32.totalorder %v1894_v44, %v1814_v13 }
  0x72   :  { %1465 = vmatpush.msk.msrb.mxu2 %vm99_vm11, %v1693_v19  ;;  %1481 = vmatpush.msk.msrb.mxu3 %vm99_vm11, %v1693_v19 }
  0x77   :  { %1526 = vxpose.xlu0.b32.cont [14/16] %v1525_v45, 128  ;;  %v42_v45 = vld [vmem:[#allocation2] sm:$0xff] }
  0x78   :  { %401 = vmatmul.f32.vlgmr.msra.gmra.mxu2 %v42_v45 }
  0x7f   :  { %1528 = vxpose.xlu0.b32.cont [15/16] %v1527_v46, 128  ;;  %v1909_v46 = vadd.s32 24, %v1812_v12 }
  0x81   :  { %vm98_vm12 = vcmp.eq.s32.totalorder %v1909_v46, %v1814_v13  ;;  %v2014_v46 = vsel %vm100_vm10, 1.0, %v1694_v21 }
  0x82   :  { %1466 = vmatpush.msk.msrb.mxu2 %vm98_vm12, %v1693_v19  ;;  %1482 = vmatpush.msk.msrb.mxu3 %vm98_vm12, %v1693_v19 }
  0x87   :  { %1530 = vxpose.xlu0.b32.end [16/16] %v1529_v47, 128  ;;  %v79_v47 = vadd.s32 16, %v1812_v12 }
  0x89   :  { %vm97_vm13 = vcmp.eq.s32.totalorder %v79_v47, %v1814_v13 }
  0x8a   :  { %1467 = vmatpush.msk.msrb.mxu2 %vm97_vm13, %v1693_v19  ;;  %1483 = vmatpush.msk.msrb.mxu3 %vm97_vm13, %v1693_v19  ;;  %v1984_v11 = vsel %vm97_vm13, 1.0, %v1694_v21 }
  0x8b   :  { %v339_v15 = vmul.f32 0.78544706, %v1984_v11 }
  0xb3   :  { %v1531_v48 = vpop.trf.xlu0 }
  0xb4   :  { %v1532_v49 = vunpack.i.l.bf16 %v1531_v48  ;;  %v1535_v50 = vunpack.i.h.bf16 %v1531_v48 }
  0xb6   :  { %223 = vmatmul.f32.vlgmr.msra.gmra.mxu0 %v1532_v49  ;;  %288 = vmatmul.f32.vlgmr.msra.gmra.mxu1 %v1535_v50 }
  0xbb   :  { %v1536_v51 = vpop.trf.xlu0 }
  0xbc   :  { %v1537_v52 = vunpack.i.l.bf16 %v1536_v51  ;;  %v1540_v53 = vunpack.i.h.bf16 %v1536_v51  ;;  %v78_v51 = vadd.s32 8, %v1812_v12 }
  0xbe   :  { %226 = vmatmul.f32.gmra.mxu0 %v1537_v52  ;;  %291 = vmatmul.f32.gmra.mxu1 %v1540_v53  ;;  %vm96_vm14 = vcmp.eq.s32.totalorder %v78_v51, %v1814_v13 }
  0xbf   :  { %1468 = vmatpush.msk.msrb.mxu2 %vm96_vm14, %v1693_v19  ;;  %1484 = vmatpush.msk.msrb.mxu3 %vm96_vm14, %v1693_v19 }
  0xc1   :  { %1469 = vmatpush.msk.msrb.mxu2 %vm95_vm15, %v1693_v19  ;;  %1485 = vmatpush.msk.msrb.mxu3 %vm95_vm15, %v1693_v19  ;;  %v1994_v19 = vsel %vm98_vm12, 1.0, %v1694_v21 }
  0xc2   :  { %v340_v26 = vmul.f32 0.78544706, %v1994_v19 }
  0xc3   :  { %v1541_v54 = vpop.trf.xlu0 }
  0xc4   :  { %v1542_v55 = vunpack.i.l.bf16 %v1541_v54  ;;  %v1545_v56 = vunpack.i.h.bf16 %v1541_v54 }
  0xc6   :  { %229 = vmatmul.f32.gmra.mxu0 %v1542_v55  ;;  %294 = vmatmul.f32.gmra.mxu1 %v1545_v56 }
  0xcb   :  { %v1546_v57 = vpop.trf.xlu0 }
  0xcc   :  { %v1547_v58 = vunpack.i.l.bf16 %v1546_v57  ;;  %v1550_v59 = vunpack.i.h.bf16 %v1546_v57 }
  0xce   :  { %232 = vmatmul.f32.gmra.mxu0 %v1547_v58  ;;  %297 = vmatmul.f32.gmra.mxu1 %v1550_v59 }
  0xd3   :  { %v1551_v60 = vpop.trf.xlu0 }
  0xd4   :  { %v1552_v61 = vunpack.i.l.bf16 %v1551_v60  ;;  %v1555_v62 = vunpack.i.h.bf16 %v1551_v60 }
  0xd6   :  { %235 = vmatmul.f32.gmra.mxu0 %v1552_v61  ;;  %300 = vmatmul.f32.gmra.mxu1 %v1555_v62  ;;  %v1967_v61 = vsel %vm95_vm15, 1.0, %v1694_v21 }
  0xdb   :  { %v1556_v63 = vpop.trf.xlu0 }
  0xdc   :  { %v1557_v0 = vunpack.i.l.bf16 %v1556_v63  ;;  %v1560_v1 = vunpack.i.h.bf16 %v1556_v63 }
  0xde   :  { %238 = vmatmul.f32.gmra.mxu0 %v1557_v0  ;;  %303 = vmatmul.f32.gmra.mxu1 %v1560_v1  ;;  %v337_v1 = vmul.f32 0.78544706, %v1967_v61 }
  0xe3   :  { %v1561_v2 = vpop.trf.xlu0 }
  0xe4   :  { %v1562_v3 = vunpack.i.l.bf16 %v1561_v2  ;;  %v1565_v4 = vunpack.i.h.bf16 %v1561_v2 }
  0xe6   :  { %241 = vmatmul.f32.gmra.mxu0 %v1562_v3  ;;  %306 = vmatmul.f32.gmra.mxu1 %v1565_v4  ;;  %v1975_v4 = vsel %vm96_vm14, 1.0, %v1694_v21 }
  0xeb   :  { %v1566_v5 = vpop.trf.xlu0 }
  0xec   :  { %v1567_v6 = vunpack.i.l.bf16 %v1566_v5  ;;  %v1570_v7 = vunpack.i.h.bf16 %v1566_v5 }
  0xee   :  { %244 = vmatmul.f32.gmra.mxu0 %v1567_v6  ;;  %309 = vmatmul.f32.gmra.mxu1 %v1570_v7  ;;  %v338_v7 = vmul.f32 0.78544706, %v1975_v4 }
  0xf3   :  { %v1571_v8 = vpop.trf.xlu0 }
  0xf4   :  { %v1572_v9 = vunpack.i.l.bf16 %v1571_v8  ;;  %v1575_v10 = vunpack.i.h.bf16 %v1571_v8 }
  0xf6   :  { %247 = vmatmul.f32.gmra.mxu0 %v1572_v9  ;;  %312 = vmatmul.f32.gmra.mxu1 %v1575_v10 }
  0xfb   :  { %v1576_v16 = vpop.trf.xlu0 }
  0xfc   :  { %v1577_v17 = vunpack.i.l.bf16 %v1576_v16  ;;  %v1580_v18 = vunpack.i.h.bf16 %v1576_v16 }
  0xfe   :  { %250 = vmatmul.f32.gmra.mxu0 %v1577_v17  ;;  %315 = vmatmul.f32.gmra.mxu1 %v1580_v18 }
 0x103   :  { %v1581_v29 = vpop.trf.xlu0 }
 0x104   :  { %v1582_v30 = vunpack.i.l.bf16 %v1581_v29  ;;  %v1585_v31 = vunpack.i.h.bf16 %v1581_v29 }
 0x106   :  { %253 = vmatmul.f32.gmra.mxu0 %v1582_v30  ;;  %318 = vmatmul.f32.gmra.mxu1 %v1585_v31  ;;  %v2004_v31 = vsel %vm99_vm11, 1.0, %v1694_v21 }
 0x10b   :  { %v1586_v40 = vpop.trf.xlu0 }
 0x10c   :  { %v1587_v41 = vunpack.i.l.bf16 %v1586_v40  ;;  %v1590_v42 = vunpack.i.h.bf16 %v1586_v40  ;;  %v341_v40 = vmul.f32 0.78544706, %v2004_v31 }
 0x10e   :  { %256 = vmatmul.f32.gmra.mxu0 %v1587_v41  ;;  %321 = vmatmul.f32.gmra.mxu1 %v1590_v42 }
 0x113   :  { %v1591_v48 = vpop.trf.xlu0 }
 0x114   :  { %v1592_v49 = vunpack.i.l.bf16 %v1591_v48  ;;  %v1595_v50 = vunpack.i.h.bf16 %v1591_v48  ;;  %v342_v48 = vmul.f32 0.78544706, %v2014_v46 }
 0x116   :  { %259 = vmatmul.f32.gmra.mxu0 %v1592_v49  ;;  %324 = vmatmul.f32.gmra.mxu1 %v1595_v50 }
 0x11b   :  { %v1596_v52 = vpop.trf.xlu0 }
 0x11c   :  { %v1597_v53 = vunpack.i.l.bf16 %v1596_v52  ;;  %v1600_v54 = vunpack.i.h.bf16 %v1596_v52  ;;  %v2024_v52 = vsel %vm101_vm9, 1.0, %v1694_v21 }
 0x11e   :  { %262 = vmatmul.f32.gmra.mxu0 %v1597_v53  ;;  %327 = vmatmul.f32.gmra.mxu1 %v1600_v54  ;;  %v343_v54 = vmul.f32 0.78544706, %v2024_v52 }
 0x123   :  { %v1601_v55 = vpop.trf.xlu0 }
 0x124   :  { %v1602_v56 = vunpack.i.l.bf16 %v1601_v55  ;;  %v1605_v57 = vunpack.i.h.bf16 %v1601_v55 }
 0x126   :  { %265 = vmatmul.f32.gmra.mxu0 %v1602_v56  ;;  %330 = vmatmul.f32.gmra.mxu1 %v1605_v57 }
 0x12b   :  { %v1606_v58 = vpop.trf.xlu0 }
 0x12c   :  { %v1607_v59 = vunpack.i.l.bf16 %v1606_v58  ;;  %v1610_v60 = vunpack.i.h.bf16 %v1606_v58  ;;  %v43_v58 = vld [vmem:[#allocation2 + $0x8] sm:$0xff] }
 0x12d   :  { %421 = vmatmul.f32.vlgmr.msra.gmra.mxu3 %v43_v58 }
 0x12e   :  { %268 = vmatmul.f32.gmra.mxu0 %v1607_v59  ;;  %333 = vmatmul.f32.gmra.mxu1 %v1610_v60  ;;  %v2034_v59 = vsel %vm102_vm8, 1.0, %v1694_v21 }
 0x133   :  { %v224_v62 = vpop.f32.mrf.mxu0  ;;  %v289_v63 = vpop.f32.mrf.mxu1 }
 0x134   :  { %v290_v0 = vadd.f32 %v289_v63, %v224_v62  ;;  %v344_v62 = vmul.f32 0.78544706, %v2034_v59 }
 0x136   :  { %v353_v2 = vmul.f32 0.42910594, %v290_v0 }
 0x138   :  { %v1970_v3 = vsub.f32 %v337_v1, %v353_v2 }
 0x13a   :  { %2634 = vst [vmem:[#allocation11_spill] sm:$0xff] %v1970_v3  ;;  %442 = vmatmul.f32.vlgmr.msrb.gmra.mxu2 %v1970_v3 }
 0x13b   :  { %v227_v5 = vpop.f32.mrf.mxu0  ;;  %v292_v6 = vpop.f32.mrf.mxu1 }
 0x13c   :  { %v293_v8 = vadd.f32 %v292_v6, %v227_v5  ;;  %v345_v6 = vmul.f32 0.78544706, %v1870_v38 }
 0x13e   :  { %v354_v9 = vmul.f32 0.42910594, %v293_v8 }
 0x140   :  { %v1979_v10 = vsub.f32 %v338_v7, %v354_v9  ;;  %v346_v9 = vmul.f32 0.78544706, %v1862_v36 }
 0x142   :  { %2635 = vst [vmem:[#allocation12_spill] sm:$0xff] %v1979_v10  ;;  %445 = vmatmul.f32.gmra.mxu2 %v1979_v10 }
 0x143   :  { %v230_v12 = vpop.f32.mrf.mxu0  ;;  %v295_v14 = vpop.f32.mrf.mxu1 }
 0x144   :  { %v296_v16 = vadd.f32 %v295_v14, %v230_v12 }
 0x146   :  { %v355_v17 = vmul.f32 0.42910594, %v296_v16 }
 0x148   :  { %v1988_v18 = vsub.f32 %v339_v15, %v355_v17 }
 0x14a   :  { %2636 = vst [vmem:[#allocation13_spill] sm:$0xff] %v1988_v18  ;;  %448 = vmatmul.f32.gmra.mxu2 %v1988_v18 }
 0x14b   :  { %v233_v20 = vpop.f32.mrf.mxu0  ;;  %v298_v24 = vpop.f32.mrf.mxu1 }
 0x14c   :  { %v299_v28 = vadd.f32 %v298_v24, %v233_v20  ;;  %v347_v20 = vmul.f32 0.78544706, %v1855_v34 }
 0x14e   :  { %v356_v29 = vmul.f32 0.42910594, %v299_v28 }
 0x150   :  { %v1998_v30 = vsub.f32 %v340_v26, %v356_v29 }
 0x152   :  { %2637 = vst [vmem:[#allocation14_spill] sm:$0xff] %v1998_v30  ;;  %451 = vmatmul.f32.gmra.mxu2 %v1998_v30 }
 0x153   :  { %v236_v33 = vpop.f32.mrf.mxu0  ;;  %v301_v35 = vpop.f32.mrf.mxu1 }
 0x154   :  { %v302_v41 = vadd.f32 %v301_v35, %v236_v33  ;;  %v348_v35 = vmul.f32 0.78544706, %v1848_v32 }
 0x156   :  { %v357_v42 = vmul.f32 0.42910594, %v302_v41 }
 0x158   :  { %v2008_v45 = vsub.f32 %v341_v40, %v357_v42 }
 0x15a   :  { %2638 = vst [vmem:[#allocation15_spill] sm:$0xff] %v2008_v45  ;;  %454 = vmatmul.f32.gmra.mxu2 %v2008_v45 }
 0x15b   :  { %v239_v44 = vpop.f32.mrf.mxu0  ;;  %v304_v47 = vpop.f32.mrf.mxu1 }
 0x15c   :  { %v305_v49 = vadd.f32 %v304_v47, %v239_v44 }
 0x15e   :  { %v358_v50 = vmul.f32 0.42910594, %v305_v49 }
 0x160   :  { %v2018_v51 = vsub.f32 %v342_v48, %v358_v50  ;;  %v349_v48 = vmul.f32 0.78544706, %v1840_v27 }
 0x162   :  { %2639 = vst [vmem:[#allocation16_spill] sm:$0xff] %v2018_v51  ;;  %457 = vmatmul.f32.gmra.mxu2 %v2018_v51 }
 0x163   :  { %v242_v43 = vpop.f32.mrf.mxu0  ;;  %v307_v53 = vpop.f32.mrf.mxu1 }
 0x164   :  { %v308_v55 = vadd.f32 %v307_v53, %v242_v43 }
 0x166   :  { %v359_v56 = vmul.f32 0.42910594, %v308_v55  ;;  %v350_v55 = vmul.f32 0.78544706, %v1834_v25 }
 0x168   :  { %v2028_v57 = vsub.f32 %v343_v54, %v359_v56 }
 0x16a   :  { %2640 = vst [vmem:[#allocation17_spill] sm:$0xff] %v2028_v57  ;;  %460 = vmatmul.f32.gmra.mxu2 %v2028_v57 }
 0x16b   :  { %v245_v39 = vpop.f32.mrf.mxu0  ;;  %v310_v60 = vpop.f32.mrf.mxu1 }
 0x16c   :  { %v311_v63 = vadd.f32 %v310_v60, %v245_v39 }
 0x16e   :  { %v360_v0 = vmul.f32 0.42910594, %v311_v63  ;;  %v351_v63 = vmul.f32 0.78544706, %v1827_v23 }
 0x170   :  { %v2038_v1 = vsub.f32 %v344_v62, %v360_v0 }
 0x172   :  { %463 = vmatmul.f32.gmra.mxu2 %v2038_v1 }
 0x173   :  { %v248_v2 = vpop.f32.mrf.mxu0  ;;  %v313_v5 = vpop.f32.mrf.mxu1 }
 0x174   :  { %v314_v13 = vadd.f32 %v313_v5, %v248_v2 }
 0x176   :  { %v361_v21 = vmul.f32 0.42910594, %v314_v13 }
 0x178   :  { %v2042_v37 = vsub.f32 %v345_v6, %v361_v21  ;;  %v352_v21 = vmul.f32 0.78544706, %v1824_v22 }
 0x17a   :  { %466 = vmatmul.f32.gmra.mxu2 %v2042_v37 }
 0x17b   :  { %v251_v7 = vpop.f32.mrf.mxu0  ;;  %v316_v8 = vpop.f32.mrf.mxu1 }
 0x17c   :  { %v317_v12 = vadd.f32 %v316_v8, %v251_v7 }
 0x17e   :  { %v362_v14 = vmul.f32 0.42910594, %v317_v12 }
 0x180   :  { %v2046_v15 = vsub.f32 %v346_v9, %v362_v14 }
 0x182   :  { %469 = vmatmul.f32.gmra.mxu2 %v2046_v15 }
 0x183   :  { %v254_v16 = vpop.f32.mrf.mxu0  ;;  %v319_v17 = vpop.f32.mrf.mxu1 }
 0x184   :  { %v320_v24 = vadd.f32 %v319_v17, %v254_v16 }
 0x186   :  { %v363_v26 = vmul.f32 0.42910594, %v320_v24 }
 0x188   :  { %v2050_v28 = vsub.f32 %v347_v20, %v363_v26 }
 0x18a   :  { %472 = vmatmul.f32.gmra.mxu2 %v2050_v28 }
 0x18b   :  { %v257_v29 = vpop.f32.mrf.mxu0  ;;  %v322_v33 = vpop.f32.mrf.mxu1 }
 0x18c   :  { %v323_v40 = vadd.f32 %v322_v33, %v257_v29  ;;  %v2131_v33 = vpop.f32.mrf.mxu2 }
 0x18d   :  { %2642 = vst [vmem:[#allocation19_spill] sm:$0xff] %v2131_v33 }
 0x18e   :  { %v364_v41 = vmul.f32 0.42910594, %v323_v40 }
 0x190   :  { %v2054_v42 = vsub.f32 %v348_v35, %v364_v41 }
 0x192   :  { %475 = vmatmul.f32.vlgmr.msrb.gmra.mxu3 %v2054_v42 }
 0x193   :  { %v260_v44 = vpop.f32.mrf.mxu0  ;;  %v325_v47 = vpop.f32.mrf.mxu1 }
 0x194   :  { %v326_v49 = vadd.f32 %v325_v47, %v260_v44 }
 0x196   :  { %v365_v50 = vmul.f32 0.42910594, %v326_v49 }
 0x198   :  { %v2058_v43 = vsub.f32 %v349_v48, %v365_v50 }
 0x19a   :  { %478 = vmatmul.f32.gmra.mxu3 %v2058_v43 }
 0x19b   :  { %v263_v53 = vpop.f32.mrf.mxu0  ;;  %v328_v54 = vpop.f32.mrf.mxu1 }
 0x19c   :  { %v329_v56 = vadd.f32 %v328_v54, %v263_v53 }
 0x19e   :  { %v366_v58 = vmul.f32 0.42910594, %v329_v56 }
 0x1a0   :  { %v2062_v39 = vsub.f32 %v350_v55, %v366_v58 }
 0x1a2   :  { %481 = vmatmul.f32.gmra.mxu3 %v2062_v39 }
 0x1a3   :  { %v266_v60 = vpop.f32.mrf.mxu0  ;;  %v331_v62 = vpop.f32.mrf.mxu1 }
 0x1a4   :  { %v332_v0 = vadd.f32 %v331_v62, %v266_v60 }
 0x1a6   :  { %v367_v2 = vmul.f32 0.42910594, %v332_v0 }
 0x1a8   :  { %v2066_v5 = vsub.f32 %v351_v63, %v367_v2 }
 0x1aa   :  { %484 = vmatmul.f32.gmra.mxu3 %v2066_v5 }
 0x1ab   :  { %v269_v6 = vpop.f32.mrf.mxu0  ;;  %v334_v13 = vpop.f32.mrf.mxu1 }
 0x1ac   :  { %v335_v7 = vadd.f32 %v334_v13, %v269_v6 }
 0x1ae   :  { %v368_v8 = vmul.f32 0.42910594, %v335_v7 }
 0x1b0   :  { %v2070_v9 = vsub.f32 %v352_v21, %v368_v8  ;;  %v2115_v12 = vpop.f32.mrf.mxu3 }
 0x1b1   :  { %2641 = vst [vmem:[#allocation18_spill] sm:$0xff] %v2115_v12 }
 0x1b2   :  { %487 = vmatmul.f32.gmra.mxu3 %v2070_v9  ;;  %588 = vmatpush.msrb.mxu0 %v2070_v9 }
 0x1b3   :  { %507 = vmatpush.msra.mxu3 %v2070_v9 }
 0x1b4   :  { %589 = vmatpush.msrb.mxu0 %v2066_v5 }
 0x1b5   :  { %508 = vmatpush.msra.mxu3 %v2066_v5 }
 0x1b6   :  { %590 = vmatpush.msrb.mxu0 %v2062_v39 }
 0x1b7   :  { %509 = vmatpush.msra.mxu3 %v2062_v39 }
 0x1b8   :  { %591 = vmatpush.msrb.mxu0 %v2058_v43 }
 0x1b9   :  { %510 = vmatpush.msra.mxu3 %v2058_v43 }
 0x1ba   :  { %592 = vmatpush.msrb.mxu0 %v2054_v42 }
 0x1bb   :  { %511 = vmatpush.msra.mxu3 %v2054_v42 }
 0x1bc   :  { %593 = vmatpush.msrb.mxu0 %v2050_v28 }
 0x1bd   :  { %512 = vmatpush.msra.mxu3 %v2050_v28  ;;  %v2139_v41 = vpop.f32.mrf.mxu2 }
 0x1be   :  { %594 = vmatpush.msrb.mxu0 %v2046_v15 }
 0x1bf   :  { %513 = vmatpush.msra.mxu3 %v2046_v15 }
 0x1c0   :  { %595 = vmatpush.msrb.mxu0 %v2042_v37 }
 0x1c1   :  { %514 = vmatpush.msra.mxu3 %v2042_v37 }
 0x1c2   :  { %596 = vmatpush.msrb.mxu0 %v2038_v1 }
 0x1c3   :  { %515 = vmatpush.msra.mxu3 %v2038_v1 }
 0x1c4   :  { %597 = vmatpush.msrb.mxu0 %v2028_v57 }
 0x1c5   :  { %516 = vmatpush.msra.mxu3 %v2028_v57  ;;  %v2144_v47 = vpop.f32.mrf.mxu2 }
 0x1c6   :  { %598 = vmatpush.msrb.mxu0 %v2018_v51 }
 0x1c7   :  { %517 = vmatpush.msra.mxu3 %v2018_v51 }
 0x1c8   :  { %599 = vmatpush.msrb.mxu0 %v2008_v45 }
 0x1c9   :  { %518 = vmatpush.msra.mxu3 %v2008_v45 }
 0x1ca   :  { %600 = vmatpush.msrb.mxu0 %v1998_v30 }
 0x1cb   :  { %519 = vmatpush.msra.mxu3 %v1998_v30 }
 0x1cc   :  { %601 = vmatpush.msrb.mxu0 %v1988_v18 }
 0x1cd   :  { %520 = vmatpush.msra.mxu3 %v1988_v18  ;;  %v2149_v49 = vpop.f32.mrf.mxu2 }
 0x1ce   :  { %602 = vmatpush.msrb.mxu0 %v1979_v10 }
 0x1cf   :  { %521 = vmatpush.msra.mxu3 %v1979_v10 }
 0x1d0   :  { %603 = vmatpush.msrb.mxu0 %v1970_v3 }
 0x1d1   :  { %522 = vmatpush.msra.mxu3 %v1970_v3 }
 0x1d2   :  { %523 = vmatmul.f32.vlgmr.msra.gmra.mxu3 %v1970_v3 }
 0x1d5   :  { %v452_v53 = vpop.f32.mrf.mxu2 }
 0x1da   :  { %526 = vmatmul.f32.gmra.mxu3 %v1979_v10 }
 0x1dd   :  { %v455_v56 = vpop.f32.mrf.mxu2 }
 0x1e2   :  { %529 = vmatmul.f32.gmra.mxu3 %v1988_v18 }
 0x1e5   :  { %v458_v60 = vpop.f32.mrf.mxu2 }
 0x1ea   :  { %532 = vmatmul.f32.gmra.mxu3 %v1998_v30 }
 0x1ed   :  { %v461_v63 = vpop.f32.mrf.mxu2 }
 0x1f2   :  { %535 = vmatmul.f32.gmra.mxu3 %v2008_v45 }
 0x1f5   :  { %v464_v2 = vpop.f32.mrf.mxu2 }
 0x1fa   :  { %538 = vmatmul.f32.gmra.mxu3 %v2018_v51 }
 0x1fd   :  { %v467_v21 = vpop.f32.mrf.mxu2 }
 0x202   :  { %541 = vmatmul.f32.gmra.mxu3 %v2028_v57 }
 0x205   :  { %v470_v8 = vpop.f32.mrf.mxu2 }
 0x20a   :  { %544 = vmatmul.f32.gmra.mxu3 %v2038_v1 }
 0x20d   :  { %v473_v57 = vpop.f32.mrf.mxu2 }
 0x212   :  { %547 = vmatmul.f32.gmra.mxu3 %v2042_v37 }
 0x215   :  { %v2118_v14 = vpop.f32.mrf.mxu3 }
 0x21a   :  { %550 = vmatmul.f32.gmra.mxu3 %v2046_v15 }
 0x21d   :  { %v479_v16 = vpop.f32.mrf.mxu3 }
 0x21e   :  { %v503_v45 = vadd.f32 %v1840_v27, %v479_v16  ;;  %v500_v27 = vadd.f32 %v1862_v36, %v470_v8  ;;  %v499_v16 = vadd.f32 %v1870_v38, %v467_v21  ;;  %v497_v36 = vadd.f32 %v2024_v52, %v461_v63 }
 0x21f   :  { %v496_v38 = vadd.f32 %v2014_v46, %v458_v60  ;;  %v494_v52 = vadd.f32 %v1994_v19, %v452_v53  ;;  %v493_v46 = vadd.f32 %v1984_v11, %v2149_v49 }
 0x222   :  { %553 = vmatmul.f32.gmra.mxu3 %v2050_v28 }
 0x225   :  { %v482_v17 = vpop.f32.mrf.mxu3 }
 0x226   :  { %v504_v18 = vadd.f32 %v1834_v25, %v482_v17  ;;  %v501_v25 = vadd.f32 %v1855_v34, %v473_v57  ;;  %v498_v34 = vadd.f32 %v2034_v59, %v464_v2 }
 0x22a   :  { %556 = vmatmul.f32.gmra.mxu3 %v2054_v42 }
 0x22d   :  { %v485_v20 = vpop.f32.mrf.mxu3 }
 0x22e   :  { %v505_v3 = vadd.f32 %v1827_v23, %v485_v20  ;;  %v502_v23 = vadd.f32 %v1848_v32, %v2118_v14  ;;  %v495_v20 = vadd.f32 %v2004_v31, %v455_v56 }
 0x232   :  { %559 = vmatmul.f32.gmra.mxu3 %v2058_v43 }
 0x235   :  { %v488_v24 = vpop.f32.mrf.mxu3 }
 0x236   :  { %v506_v12 = vadd.f32 %v1824_v22, %v488_v24 }
 0x23a   :  { %562 = vmatmul.f32.gmra.mxu3 %v2062_v39 }
 0x242   :  { %565 = vmatmul.f32.gmra.mxu3 %v2066_v5 }
 0x24a   :  { %568 = vmatmul.f32.gmra.mxu3 %v2070_v9 }
 0x255   :  { %v2125_v26 = vpop.f32.mrf.mxu3 }
 0x256   :  { %604 = vmatmul.f32.vlgmr.msrb.gmra.mxu0 %v2125_v26 }
 0x25d   :  { %v2128_v29 = vpop.f32.mrf.mxu3 }
 0x25e   :  { %607 = vmatmul.f32.gmra.mxu0 %v2128_v29 }
 0x265   :  { %v2133_v35 = vpop.f32.mrf.mxu3 }
 0x266   :  { %610 = vmatmul.f32.gmra.mxu0 %v2133_v35  ;;  %v2218_v19 = vadd.f32 %v2133_v35, %v493_v46 }
 0x26d   :  { %v2136_v40 = vpop.f32.mrf.mxu3 }
 0x26e   :  { %613 = vmatmul.f32.gmra.mxu0 %v2136_v40  ;;  %v2212_v31 = vadd.f32 %v2136_v40, %v494_v52 }
 0x275   :  { %v2141_v44 = vpop.f32.mrf.mxu3 }
 0x276   :  { %616 = vmatmul.f32.gmra.mxu0 %v2141_v44 }
 0x27d   :  { %v2146_v48 = vpop.f32.mrf.mxu3 }
 0x27e   :  { %619 = vmatmul.f32.gmra.mxu0 %v2146_v48  ;;  %v2199_v59 = vadd.f32 %v2146_v48, %v496_v38  ;;  %v492_v48 = vadd.f32 %v1975_v4, %v2144_v47 }
 0x280   :  { %v2224_v11 = vadd.f32 %v2128_v29, %v492_v48 }
 0x285   :  { %v542_v50 = vpop.f32.mrf.mxu3 }
 0x286   :  { %622 = vmatmul.f32.gmra.mxu0 %v542_v50  ;;  %v2194_v17 = vadd.f32 %v542_v50, %v497_v36 }
 0x28d   :  { %v545_v54 = vpop.f32.mrf.mxu3 }
 0x28e   :  { %625 = vmatmul.f32.gmra.mxu0 %v545_v54  ;;  %v2190_v14 = vadd.f32 %v545_v54, %v498_v34 }
 0x295   :  { %v548_v55 = vpop.f32.mrf.mxu3 }
 0x296   :  { %628 = vmatmul.f32.gmra.mxu0 %v548_v55  ;;  %v2186_v57 = vadd.f32 %v548_v55, %v499_v16 }
 0x29d   :  { %v551_v58 = vpop.f32.mrf.mxu3 }
 0x29e   :  { %631 = vmatmul.f32.gmra.mxu0 %v551_v58  ;;  %v2180_v32 = vadd.f32 %v551_v58, %v500_v27 }
 0x2a5   :  { %v554_v62 = vpop.f32.mrf.mxu3 }
 0x2a6   :  { %634 = vmatmul.f32.gmra.mxu0 %v554_v62 }
 0x2ad   :  { %v557_v0 = vpop.f32.mrf.mxu3 }
 0x2ae   :  { %637 = vmatmul.f32.gmra.mxu0 %v557_v0 }
 0x2b5   :  { %v560_v6 = vpop.f32.mrf.mxu3 }
 0x2b6   :  { %640 = vmatmul.f32.gmra.mxu0 %v560_v6 }
 0x2bd   :  { %v563_v13 = vpop.f32.mrf.mxu3 }
 0x2be   :  { %643 = vmatmul.f32.gmra.mxu0 %v563_v13  ;;  %v2161_v51 = vadd.f32 %v563_v13, %v504_v18  ;;  %v2176_v18 = vadd.f32 %v554_v62, %v501_v25 }
 0x2c5   :  { %v566_v7 = vpop.f32.mrf.mxu3 }
 0x2c6   :  { %646 = vmatmul.f32.gmra.mxu0 %v566_v7  ;;  %v2157_v30 = vadd.f32 %v566_v7, %v505_v3  ;;  %v2172_v3 = vadd.f32 %v557_v0, %v502_v23 }
 0x2cd   :  { %v569_v33 = vpop.f32.mrf.mxu3 }
 0x2ce   :  { %649 = vmatmul.f32.gmra.mxu0 %v569_v33  ;;  %v2153_v10 = vadd.f32 %v569_v33, %v506_v12  ;;  %v2168_v12 = vadd.f32 %v560_v6, %v503_v45  ;;  %v2206_v33 = vadd.f32 %v2141_v44, %v495_v20  ;;  %v491_v44 = vadd.f32 %v1967_v61, %v2139_v41 }
 0x2d0   :  { %653 = vmatpush.msrb.mxu1 %v2153_v10  ;;  %v2228_v40 = vadd.f32 %v2125_v26, %v491_v44 }
 0x2d2   :  { %654 = vmatpush.msrb.mxu1 %v2157_v30 }
 0x2d3   :  { %v2163_v22 = vpop.f32.mrf.mxu0 }
 0x2d4   :  { %655 = vmatpush.msrb.mxu1 %v2161_v51 }
 0x2d6   :  { %656 = vmatpush.msrb.mxu1 %v2168_v12 }
 0x2d8   :  { %657 = vmatpush.msrb.mxu1 %v2172_v3 }
 0x2da   :  { %658 = vmatpush.msrb.mxu1 %v2176_v18 }
 0x2db   :  { %v2182_v45 = vpop.f32.mrf.mxu0 }
 0x2dc   :  { %659 = vmatpush.msrb.mxu1 %v2180_v32 }
 0x2de   :  { %660 = vmatpush.msrb.mxu1 %v2186_v57 }
 0x2e0   :  { %661 = vmatpush.msrb.mxu1 %v2190_v14 }
 0x2e2   :  { %662 = vmatpush.msrb.mxu1 %v2194_v17 }
 0x2e3   :  { %v2201_v24 = vpop.f32.mrf.mxu0 }
 0x2e4   :  { %663 = vmatpush.msrb.mxu1 %v2199_v59 }
 0x2e6   :  { %664 = vmatpush.msrb.mxu1 %v2206_v33 }
 0x2e8   :  { %665 = vmatpush.msrb.mxu1 %v2212_v31 }
 0x2ea   :  { %666 = vmatpush.msrb.mxu1 %v2218_v19 }
 0x2eb   :  { %v614_v49 = vpop.f32.mrf.mxu0 }
 0x2ec   :  { %667 = vmatpush.msrb.mxu1 %v2224_v11 }
 0x2ee   :  { %668 = vmatpush.msrb.mxu1 %v2228_v40 }
 0x2ef   :  { %669 = vmatmul.f32.vlgmr.msrb.gmra.mxu1 %v2163_v22 }
 0x2f3   :  { %v617_v4 = vpop.f32.mrf.mxu0 }
 0x2f7   :  { %672 = vmatmul.f32.gmra.mxu1 %v2182_v45 }
 0x2fb   :  { %v620_v35 = vpop.f32.mrf.mxu0 }
 0x2ff   :  { %675 = vmatmul.f32.gmra.mxu1 %v2201_v24 }
 0x303   :  { %v623_v61 = vpop.f32.mrf.mxu0 }
 0x307   :  { %678 = vmatmul.f32.gmra.mxu1 %v614_v49 }
 0x30b   :  { %v626_v29 = vpop.f32.mrf.mxu0 }
 0x30f   :  { %681 = vmatmul.f32.gmra.mxu1 %v617_v4 }
 0x313   :  { %v629_v41 = vpop.f32.mrf.mxu0 }
 0x317   :  { %684 = vmatmul.f32.gmra.mxu1 %v620_v35 }
 0x31b   :  { %v632_v47 = vpop.f32.mrf.mxu0 }
 0x31f   :  { %687 = vmatmul.f32.gmra.mxu1 %v623_v61 }
 0x323   :  { %v635_v26 = vpop.f32.mrf.mxu0 }
 0x327   :  { %690 = vmatmul.f32.gmra.mxu1 %v626_v29 }
 0x32b   :  { %v638_v50 = vpop.f32.mrf.mxu0 }
 0x32f   :  { %693 = vmatmul.f32.gmra.mxu1 %v629_v41 }
 0x333   :  { %v641_v53 = vpop.f32.mrf.mxu0 }
 0x337   :  { %696 = vmatmul.f32.gmra.mxu1 %v632_v47 }
 0x33b   :  { %v644_v54 = vpop.f32.mrf.mxu0 }
 0x33f   :  { %699 = vmatmul.f32.gmra.mxu1 %v635_v26 }
 0x343   :  { %v647_v55 = vpop.f32.mrf.mxu0 }
 0x347   :  { %702 = vmatmul.f32.gmra.mxu1 %v638_v50 }
 0x34b   :  { %v650_v56 = vpop.f32.mrf.mxu0 }
 0x34c   :  { %734 = vmatpush.msra.mxu2 %v650_v56 }
 0x34e   :  { %735 = vmatpush.msra.mxu2 %v647_v55 }
 0x34f   :  { %705 = vmatmul.f32.gmra.mxu1 %v641_v53 }
 0x350   :  { %736 = vmatpush.msra.mxu2 %v644_v54 }
 0x352   :  { %737 = vmatpush.msra.mxu2 %v641_v53 }
 0x354   :  { %738 = vmatpush.msra.mxu2 %v638_v50 }
 0x356   :  { %739 = vmatpush.msra.mxu2 %v635_v26 }
 0x357   :  { %708 = vmatmul.f32.gmra.mxu1 %v644_v54 }
 0x358   :  { %740 = vmatpush.msra.mxu2 %v632_v47 }
 0x35a   :  { %741 = vmatpush.msra.mxu2 %v629_v41 }
 0x35c   :  { %742 = vmatpush.msra.mxu2 %v626_v29 }
 0x35e   :  { %743 = vmatpush.msra.mxu2 %v623_v61 }
 0x35f   :  { %711 = vmatmul.f32.gmra.mxu1 %v647_v55 }
 0x360   :  { %744 = vmatpush.msra.mxu2 %v620_v35 }
 0x362   :  { %745 = vmatpush.msra.mxu2 %v617_v4 }
 0x364   :  { %746 = vmatpush.msra.mxu2 %v614_v49 }
 0x366   :  { %747 = vmatpush.msra.mxu2 %v2201_v24 }
 0x367   :  { %714 = vmatmul.f32.gmra.mxu1 %v650_v56 }
 0x368   :  { %748 = vmatpush.msra.mxu2 %v2182_v45 }
 0x36a   :  { %749 = vmatpush.msra.mxu2 %v2163_v22 }
 0x36b   :  { %750 = vmatmul.f32.vlgmr.msra.gmra.mxu2 %v2163_v22 }
 0x36c   :  { %v2238_v58 = vpop.f32.mrf.mxu1 }
 0x373   :  { %753 = vmatmul.f32.gmra.mxu2 %v2182_v45 }
 0x374   :  { %v673_v60 = vpop.f32.mrf.mxu1 }
 0x37b   :  { %756 = vmatmul.f32.gmra.mxu2 %v2201_v24 }
 0x37c   :  { %v676_v62 = vpop.f32.mrf.mxu1 }
 0x383   :  { %759 = vmatmul.f32.gmra.mxu2 %v614_v49 }
 0x384   :  { %v679_v63 = vpop.f32.mrf.mxu1 }
 0x38b   :  { %762 = vmatmul.f32.gmra.mxu2 %v617_v4 }
 0x38c   :  { %v682_v0 = vpop.f32.mrf.mxu1 }
 0x393   :  { %765 = vmatmul.f32.gmra.mxu2 %v620_v35 }
 0x394   :  { %v685_v2 = vpop.f32.mrf.mxu1 }
 0x39b   :  { %768 = vmatmul.f32.gmra.mxu2 %v623_v61 }
 0x39c   :  { %v688_v6 = vpop.f32.mrf.mxu1 }
 0x3a3   :  { %771 = vmatmul.f32.gmra.mxu2 %v626_v29 }
 0x3a4   :  { %v691_v13 = vpop.f32.mrf.mxu1 }
 0x3ab   :  { %774 = vmatmul.f32.gmra.mxu2 %v629_v41 }
 0x3ac   :  { %v694_v21 = vpop.f32.mrf.mxu1 }
 0x3b3   :  { %777 = vmatmul.f32.gmra.mxu2 %v632_v47 }
 0x3b4   :  { %v697_v7 = vpop.f32.mrf.mxu1 }
 0x3bb   :  { %780 = vmatmul.f32.gmra.mxu2 %v635_v26 }
 0x3bc   :  { %v700_v8 = vpop.f32.mrf.mxu1 }
 0x3c3   :  { %783 = vmatmul.f32.gmra.mxu2 %v638_v50 }
 0x3c4   :  { %v703_v22 = vpop.f32.mrf.mxu1 }
 0x3c5   :  { %v2258_v20 = vadd.f32 %v703_v22, %v2172_v3  ;;  %v2276_v3 = vadd.f32 %v691_v13, %v2190_v14  ;;  %v2294_v14 = vadd.f32 %v679_v63, %v2212_v31 }
 0x3cb   :  { %786 = vmatmul.f32.gmra.mxu2 %v641_v53 }
 0x3cc   :  { %v706_v23 = vpop.f32.mrf.mxu1 }
 0x3cd   :  { %v2254_v38 = vadd.f32 %v706_v23, %v2168_v12  ;;  %v2272_v12 = vadd.f32 %v694_v21, %v2186_v57  ;;  %v2290_v57 = vadd.f32 %v682_v0, %v2206_v33  ;;  %v2309_v33 = vadd.f32 %v2238_v58, %v2228_v40 }
 0x3d3   :  { %789 = vmatmul.f32.gmra.mxu2 %v644_v54 }
 0x3d4   :  { %v709_v25 = vpop.f32.mrf.mxu1 }
 0x3d5   :  { %v2250_v36 = vadd.f32 %v709_v25, %v2161_v51  ;;  %v2268_v51 = vadd.f32 %v697_v7, %v2180_v32  ;;  %v2286_v32 = vadd.f32 %v685_v2, %v2199_v59  ;;  %v2304_v59 = vadd.f32 %v673_v60, %v2224_v11 }
 0x3db   :  { %792 = vmatmul.f32.gmra.mxu2 %v647_v55 }
 0x3dc   :  { %v712_v27 = vpop.f32.mrf.mxu1 }
 0x3dd   :  { %v2246_v34 = vadd.f32 %v712_v27, %v2157_v30  ;;  %v2264_v30 = vadd.f32 %v700_v8, %v2176_v18  ;;  %v2282_v18 = vadd.f32 %v688_v6, %v2194_v17  ;;  %v2300_v17 = vadd.f32 %v676_v62, %v2218_v19 }
 0x3e3   :  { %795 = vmatmul.f32.gmra.mxu2 %v650_v56 }
 0x3e4   :  { %v715_v16 = vpop.f32.mrf.mxu1 }
 0x3e5   :  { %v2243_v45 = vadd.f32 %v715_v16, %v2153_v10 }
 0x3e7   :  { %799 = vmatpush.msrb.mxu3 %v2243_v45 }
 0x3e9   :  { %800 = vmatpush.msrb.mxu3 %v2246_v34 }
 0x3eb   :  { %801 = vmatpush.msrb.mxu3 %v2250_v36 }
 0x3ed   :  { %802 = vmatpush.msrb.mxu3 %v2254_v38 }
 0x3ee   :  { %v2261_v10 = vpop.f32.mrf.mxu2 }
 0x3ef   :  { %803 = vmatpush.msrb.mxu3 %v2258_v20 }
 0x3f1   :  { %804 = vmatpush.msrb.mxu3 %v2264_v30 }
 0x3f3   :  { %805 = vmatpush.msrb.mxu3 %v2268_v51 }
 0x3f5   :  { %806 = vmatpush.msrb.mxu3 %v2272_v12 }
 0x3f6   :  { %v2279_v24 = vpop.f32.mrf.mxu2 }
 0x3f7   :  { %807 = vmatpush.msrb.mxu3 %v2276_v3 }
 0x3f9   :  { %808 = vmatpush.msrb.mxu3 %v2282_v18 }
 0x3fb   :  { %809 = vmatpush.msrb.mxu3 %v2286_v32 }
 0x3fd   :  { %810 = vmatpush.msrb.mxu3 %v2290_v57 }
 0x3fe   :  { %v2297_v52 = vpop.f32.mrf.mxu2 }
 0x3ff   :  { %811 = vmatpush.msrb.mxu3 %v2294_v14 }
 0x401   :  { %812 = vmatpush.msrb.mxu3 %v2300_v17 }
 0x403   :  { %813 = vmatpush.msrb.mxu3 %v2304_v59 }
 0x405   :  { %814 = vmatpush.msrb.mxu3 %v2309_v33 }
 0x406   :  { %v2313_v46 = vpop.f32.mrf.mxu2  ;;  %815 = vmatmul.f32.vlgmr.msrb.gmra.mxu3 %v2261_v10 }
 0x407   :  { %1107 = vmatpush.msra.mxu3 %v2070_v9 }
 0x409   :  { %1108 = vmatpush.msra.mxu3 %v2066_v5  ;;  %v2643_v5 = vld [vmem:[#allocation17_spill] sm:$0xff] }
 0x40b   :  { %1109 = vmatpush.msra.mxu3 %v2062_v39  ;;  %v2644_v39 = vld [vmem:[#allocation16_spill] sm:$0xff] }
 0x40d   :  { %1110 = vmatpush.msra.mxu3 %v2058_v43  ;;  %v2645_v43 = vld [vmem:[#allocation15_spill] sm:$0xff] }
 0x40e   :  { %v763_v31 = vpop.f32.mrf.mxu2  ;;  %818 = vmatmul.f32.gmra.mxu3 %v2279_v24 }
 0x40f   :  { %1111 = vmatpush.msra.mxu3 %v2054_v42  ;;  %v2646_v42 = vld [vmem:[#allocation14_spill] sm:$0xff] }
 0x411   :  { %1112 = vmatpush.msra.mxu3 %v2050_v28  ;;  %v2647_v28 = vld [vmem:[#allocation13_spill] sm:$0xff] }
 0x413   :  { %1113 = vmatpush.msra.mxu3 %v2046_v15  ;;  %v2648_v15 = vld [vmem:[#allocation12_spill] sm:$0xff] }
 0x415   :  { %1114 = vmatpush.msra.mxu3 %v2042_v37  ;;  %v2649_v37 = vld [vmem:[#allocation11_spill] sm:$0xff] }
 0x416   :  { %v766_v48 = vpop.f32.mrf.mxu2  ;;  %821 = vmatmul.f32.gmra.mxu3 %v2297_v52 }
 0x417   :  { %1115 = vmatpush.msra.mxu3 %v2038_v1 }
 0x419   :  { %1116 = vmatpush.msra.mxu3 %v2643_v5 }
 0x41b   :  { %1117 = vmatpush.msra.mxu3 %v2644_v39 }
 0x41d   :  { %1118 = vmatpush.msra.mxu3 %v2645_v43 }
 0x41e   :  { %v769_v9 = vpop.f32.mrf.mxu2  ;;  %824 = vmatmul.f32.gmra.mxu3 %v2313_v46 }
 0x41f   :  { %1119 = vmatpush.msra.mxu3 %v2646_v42 }
 0x421   :  { %1120 = vmatpush.msra.mxu3 %v2647_v28 }
 0x423   :  { %1121 = vmatpush.msra.mxu3 %v2648_v15 }
 0x425   :  { %1122 = vmatpush.msra.mxu3 %v2649_v37 }
 0x426   :  { %v772_v19 = vpop.f32.mrf.mxu2  ;;  %827 = vmatmul.f32.gmra.mxu3 %v763_v31 }
 0x42e   :  { %v775_v1 = vpop.f32.mrf.mxu2  ;;  %830 = vmatmul.f32.gmra.mxu3 %v766_v48 }
 0x436   :  { %v778_v44 = vpop.f32.mrf.mxu2  ;;  %833 = vmatmul.f32.gmra.mxu3 %v769_v9 }
 0x43e   :  { %v781_v11 = vpop.f32.mrf.mxu2  ;;  %836 = vmatmul.f32.gmra.mxu3 %v772_v19 }
 0x446   :  { %v784_v49 = vpop.f32.mrf.mxu2  ;;  %839 = vmatmul.f32.gmra.mxu3 %v775_v1 }
 0x44e   :  { %v787_v40 = vpop.f32.mrf.mxu2  ;;  %842 = vmatmul.f32.gmra.mxu3 %v778_v44 }
 0x456   :  { %v790_v4 = vpop.f32.mrf.mxu2  ;;  %845 = vmatmul.f32.gmra.mxu3 %v781_v11 }
 0x45e   :  { %v793_v35 = vpop.f32.mrf.mxu2  ;;  %848 = vmatmul.f32.gmra.mxu3 %v784_v49 }
 0x466   :  { %v796_v61 = vpop.f32.mrf.mxu2  ;;  %851 = vmatmul.f32.gmra.mxu3 %v787_v40 }
 0x467   :  { %880 = vmatpush.msra.mxu0 %v796_v61 }
 0x469   :  { %881 = vmatpush.msra.mxu0 %v793_v35 }
 0x46b   :  { %882 = vmatpush.msra.mxu0 %v790_v4 }
 0x46d   :  { %883 = vmatpush.msra.mxu0 %v787_v40 }
 0x46e   :  { %854 = vmatmul.f32.gmra.mxu3 %v790_v4 }
 0x46f   :  { %884 = vmatpush.msra.mxu0 %v784_v49 }
 0x471   :  { %885 = vmatpush.msra.mxu0 %v781_v11 }
 0x473   :  { %886 = vmatpush.msra.mxu0 %v778_v44 }
 0x475   :  { %887 = vmatpush.msra.mxu0 %v775_v1 }
 0x476   :  { %857 = vmatmul.f32.gmra.mxu3 %v793_v35 }
 0x477   :  { %888 = vmatpush.msra.mxu0 %v772_v19 }
 0x479   :  { %889 = vmatpush.msra.mxu0 %v769_v9 }
 0x47b   :  { %890 = vmatpush.msra.mxu0 %v766_v48 }
 0x47d   :  { %891 = vmatpush.msra.mxu0 %v763_v31 }
 0x47e   :  { %860 = vmatmul.f32.gmra.mxu3 %v796_v61 }
 0x47f   :  { %892 = vmatpush.msra.mxu0 %v2313_v46 }
 0x481   :  { %893 = vmatpush.msra.mxu0 %v2297_v52 }
 0x483   :  { %894 = vmatpush.msra.mxu0 %v2279_v24 }
 0x485   :  { %895 = vmatpush.msra.mxu0 %v2261_v10 }
 0x486   :  { %896 = vmatmul.f32.vlgmr.msra.gmra.mxu0 %v2261_v10 }
 0x489   :  { %v2340_v29 = vpop.f32.mrf.mxu3 }
 0x48e   :  { %899 = vmatmul.f32.gmra.mxu0 %v2279_v24  ;;  %v2410_v24 = vadd.f32 %v2340_v29, %v2309_v33 }
 0x491   :  { %v819_v41 = vpop.f32.mrf.mxu3 }
 0x496   :  { %902 = vmatmul.f32.gmra.mxu0 %v2297_v52 }
 0x499   :  { %v822_v47 = vpop.f32.mrf.mxu3 }
 0x49e   :  { %905 = vmatmul.f32.gmra.mxu0 %v2313_v46 }
 0x4a1   :  { %v825_v26 = vpop.f32.mrf.mxu3 }
 0x4a6   :  { %908 = vmatmul.f32.gmra.mxu0 %v763_v31 }
 0x4a9   :  { %v828_v50 = vpop.f32.mrf.mxu3 }
 0x4aa   :  { %v2393_v10 = vadd.f32 %v828_v50, %v2290_v57 }
 0x4ae   :  { %911 = vmatmul.f32.gmra.mxu0 %v766_v48 }
 0x4b1   :  { %v831_v53 = vpop.f32.mrf.mxu3 }
 0x4b6   :  { %914 = vmatmul.f32.gmra.mxu0 %v769_v9 }
 0x4b9   :  { %v834_v54 = vpop.f32.mrf.mxu3 }
 0x4be   :  { %917 = vmatmul.f32.gmra.mxu0 %v772_v19 }
 0x4c1   :  { %v837_v55 = vpop.f32.mrf.mxu3 }
 0x4c6   :  { %920 = vmatmul.f32.gmra.mxu0 %v775_v1 }
 0x4c9   :  { %v840_v56 = vpop.f32.mrf.mxu3 }
 0x4ce   :  { %923 = vmatmul.f32.gmra.mxu0 %v778_v44 }
 0x4d1   :  { %v843_v58 = vpop.f32.mrf.mxu3 }
 0x4d2   :  { %v2373_v16 = vadd.f32 %v843_v58, %v2268_v51 }
 0x4d6   :  { %926 = vmatmul.f32.gmra.mxu0 %v781_v11 }
 0x4d9   :  { %v846_v60 = vpop.f32.mrf.mxu3 }
 0x4da   :  { %v2369_v27 = vadd.f32 %v846_v60, %v2264_v30  ;;  %v2397_v30 = vadd.f32 %v825_v26, %v2294_v14 }
 0x4de   :  { %929 = vmatmul.f32.gmra.mxu0 %v784_v49 }
 0x4e1   :  { %v849_v62 = vpop.f32.mrf.mxu3 }
 0x4e2   :  { %v2363_v23 = vadd.f32 %v849_v62, %v2258_v20  ;;  %v2389_v20 = vadd.f32 %v831_v53, %v2286_v32 }
 0x4e6   :  { %932 = vmatmul.f32.gmra.mxu0 %v787_v40 }
 0x4e9   :  { %v852_v63 = vpop.f32.mrf.mxu3 }
 0x4ea   :  { %v2359_v22 = vadd.f32 %v852_v63, %v2254_v38  ;;  %v2385_v38 = vadd.f32 %v834_v54, %v2282_v18 }
 0x4ee   :  { %935 = vmatmul.f32.gmra.mxu0 %v790_v4 }
 0x4f1   :  { %v855_v0 = vpop.f32.mrf.mxu3 }
 0x4f2   :  { %v2355_v8 = vadd.f32 %v855_v0, %v2250_v36 }
 0x4f6   :  { %938 = vmatmul.f32.gmra.mxu0 %v793_v35 }
 0x4f9   :  { %v858_v2 = vpop.f32.mrf.mxu3 }
 0x4fa   :  { %v2351_v7 = vadd.f32 %v858_v2, %v2246_v34  ;;  %v2381_v34 = vadd.f32 %v837_v55, %v2276_v3  ;;  %v2405_v3 = vadd.f32 %v819_v41, %v2304_v59 }
 0x4fe   :  { %941 = vmatmul.f32.gmra.mxu0 %v796_v61 }
 0x501   :  { %v861_v6 = vpop.f32.mrf.mxu3 }
 0x502   :  { %v2346_v13 = vadd.f32 %v861_v6, %v2243_v45  ;;  %v2377_v45 = vadd.f32 %v840_v56, %v2272_v12  ;;  %v2401_v12 = vadd.f32 %v822_v47, %v2300_v17 }
 0x503   :  { %v2348_v21 = vpop.f32.mrf.mxu0 }
 0x504   :  { %945 = vmatpush.msra.mxu1 %v2346_v13 }
 0x506   :  { %946 = vmatpush.msra.mxu1 %v2351_v7 }
 0x508   :  { %947 = vmatpush.msra.mxu1 %v2355_v8 }
 0x50a   :  { %948 = vmatpush.msra.mxu1 %v2359_v22 }
 0x50b   :  { %v2366_v25 = vpop.f32.mrf.mxu0 }
 0x50c   :  { %949 = vmatpush.msra.mxu1 %v2363_v23 }
 0x50e   :  { %950 = vmatpush.msra.mxu1 %v2369_v27 }
 0x510   :  { %951 = vmatpush.msra.mxu1 %v2373_v16 }
 0x512   :  { %952 = vmatpush.msra.mxu1 %v2377_v45 }
 0x513   :  { %v903_v36 = vpop.f32.mrf.mxu0 }
 0x514   :  { %953 = vmatpush.msra.mxu1 %v2381_v34 }
 0x516   :  { %954 = vmatpush.msra.mxu1 %v2385_v38 }
 0x518   :  { %955 = vmatpush.msra.mxu1 %v2389_v20 }
 0x51a   :  { %956 = vmatpush.msra.mxu1 %v2393_v10 }
 0x51b   :  { %v906_v51 = vpop.f32.mrf.mxu0 }
 0x51c   :  { %957 = vmatpush.msra.mxu1 %v2397_v30 }
 0x51e   :  { %958 = vmatpush.msra.mxu1 %v2401_v12 }
 0x520   :  { %959 = vmatpush.msra.mxu1 %v2405_v3 }
 0x522   :  { %960 = vmatpush.msra.mxu1 %v2410_v24 }
 0x523   :  { %v909_v18 = vpop.f32.mrf.mxu0  ;;  %961 = vmatmul.f32.vlgmr.msra.gmra.mxu1 %v2348_v21 }
 0x52b   :  { %v912_v32 = vpop.f32.mrf.mxu0  ;;  %964 = vmatmul.f32.gmra.mxu1 %v2366_v25 }
 0x533   :  { %v915_v57 = vpop.f32.mrf.mxu0  ;;  %967 = vmatmul.f32.gmra.mxu1 %v903_v36 }
 0x53b   :  { %v918_v14 = vpop.f32.mrf.mxu0  ;;  %970 = vmatmul.f32.gmra.mxu1 %v906_v51 }
 0x543   :  { %v921_v52 = vpop.f32.mrf.mxu0  ;;  %973 = vmatmul.f32.gmra.mxu1 %v909_v18 }
 0x54b   :  { %v924_v17 = vpop.f32.mrf.mxu0  ;;  %976 = vmatmul.f32.gmra.mxu1 %v912_v32 }
 0x553   :  { %v927_v59 = vpop.f32.mrf.mxu0  ;;  %979 = vmatmul.f32.gmra.mxu1 %v915_v57 }
 0x55b   :  { %v930_v33 = vpop.f32.mrf.mxu0  ;;  %982 = vmatmul.f32.gmra.mxu1 %v918_v14 }
 0x563   :  { %v933_v46 = vpop.f32.mrf.mxu0  ;;  %985 = vmatmul.f32.gmra.mxu1 %v921_v52 }
 0x56b   :  { %v936_v31 = vpop.f32.mrf.mxu0  ;;  %988 = vmatmul.f32.gmra.mxu1 %v924_v17 }
 0x573   :  { %v939_v48 = vpop.f32.mrf.mxu0  ;;  %991 = vmatmul.f32.gmra.mxu1 %v927_v59 }
 0x57b   :  { %v942_v5 = vpop.f32.mrf.mxu0  ;;  %994 = vmatmul.f32.gmra.mxu1 %v930_v33 }
 0x57c   :  { %1026 = vmatpush.msrb.mxu2 %v942_v5 }
 0x57e   :  { %1027 = vmatpush.msrb.mxu2 %v939_v48 }
 0x580   :  { %1028 = vmatpush.msrb.mxu2 %v936_v31 }
 0x582   :  { %1029 = vmatpush.msrb.mxu2 %v933_v46 }
 0x583   :  { %997 = vmatmul.f32.gmra.mxu1 %v933_v46 }
 0x584   :  { %1030 = vmatpush.msrb.mxu2 %v930_v33 }
 0x586   :  { %1031 = vmatpush.msrb.mxu2 %v927_v59 }
 0x588   :  { %1032 = vmatpush.msrb.mxu2 %v924_v17 }
 0x58a   :  { %1033 = vmatpush.msrb.mxu2 %v921_v52 }
 0x58b   :  { %1000 = vmatmul.f32.gmra.mxu1 %v936_v31 }
 0x58c   :  { %1034 = vmatpush.msrb.mxu2 %v918_v14 }
 0x58e   :  { %1035 = vmatpush.msrb.mxu2 %v915_v57 }
 0x590   :  { %1036 = vmatpush.msrb.mxu2 %v912_v32 }
 0x592   :  { %1037 = vmatpush.msrb.mxu2 %v909_v18 }
 0x593   :  { %1003 = vmatmul.f32.gmra.mxu1 %v939_v48 }
 0x594   :  { %1038 = vmatpush.msrb.mxu2 %v906_v51 }
 0x596   :  { %1039 = vmatpush.msrb.mxu2 %v903_v36 }
 0x598   :  { %1040 = vmatpush.msrb.mxu2 %v2366_v25 }
 0x59a   :  { %1041 = vmatpush.msrb.mxu2 %v2348_v21 }
 0x59b   :  { %1006 = vmatmul.f32.gmra.mxu1 %v942_v5  ;;  %1042 = vmatmul.f32.vlgmr.msrb.gmra.mxu2 %v2348_v21 }
 0x5a0   :  { %v2420_v39 = vpop.f32.mrf.mxu1 }
 0x5a3   :  { %1045 = vmatmul.f32.gmra.mxu2 %v2366_v25 }
 0x5a8   :  { %v2422_v43 = vpop.f32.mrf.mxu1 }
 0x5ab   :  { %1048 = vmatmul.f32.gmra.mxu2 %v903_v36 }
 0x5b0   :  { %v2424_v9 = vpop.f32.mrf.mxu1 }
 0x5b3   :  { %1051 = vmatmul.f32.gmra.mxu2 %v906_v51 }
 0x5b8   :  { %v2426_v42 = vpop.f32.mrf.mxu1 }
 0x5bb   :  { %1054 = vmatmul.f32.gmra.mxu2 %v909_v18 }
 0x5c0   :  { %v2431_v15 = vpop.f32.mrf.mxu1 }
 0x5c3   :  { %1057 = vmatmul.f32.gmra.mxu2 %v912_v32 }
 0x5c8   :  { %v2436_v19 = vpop.f32.mrf.mxu1 }
 0x5cb   :  { %1060 = vmatmul.f32.gmra.mxu2 %v915_v57 }
 0x5d0   :  { %v980_v11 = vpop.f32.mrf.mxu1 }
 0x5d3   :  { %1063 = vmatmul.f32.gmra.mxu2 %v918_v14 }
 0x5d8   :  { %v983_v40 = vpop.f32.mrf.mxu1 }
 0x5db   :  { %1066 = vmatmul.f32.gmra.mxu2 %v921_v52 }
 0x5e0   :  { %v986_v35 = vpop.f32.mrf.mxu1 }
 0x5e1   :  { %v1018_v47 = vadd.f32 %v986_v35, %v2377_v45 }
 0x5e3   :  { %1069 = vmatmul.f32.gmra.mxu2 %v924_v17 }
 0x5e8   :  { %v989_v29 = vpop.f32.mrf.mxu1 }
 0x5eb   :  { %1072 = vmatmul.f32.gmra.mxu2 %v927_v59 }
 0x5f0   :  { %v992_v53 = vpop.f32.mrf.mxu1 }
 0x5f3   :  { %1075 = vmatmul.f32.gmra.mxu2 %v930_v33 }
 0x5f8   :  { %v995_v55 = vpop.f32.mrf.mxu1 }
 0x5fb   :  { %1078 = vmatmul.f32.gmra.mxu2 %v933_v46 }
 0x600   :  { %v998_v58 = vpop.f32.mrf.mxu1 }
 0x601   :  { %v1022_v57 = vadd.f32 %v998_v58, %v2359_v22 }
 0x603   :  { %1081 = vmatmul.f32.gmra.mxu2 %v936_v31 }
 0x608   :  { %v1001_v62 = vpop.f32.mrf.mxu1 }
 0x609   :  { %v1023_v18 = vadd.f32 %v1001_v62, %v2355_v8  ;;  %v1019_v8 = vadd.f32 %v989_v29, %v2373_v16  ;;  %v1015_v16 = vadd.f32 %v2436_v19, %v2389_v20  ;;  %v1012_v20 = vadd.f32 %v2424_v9, %v2401_v12 }
 0x60b   :  { %1084 = vmatmul.f32.gmra.mxu2 %v939_v48 }
 0x610   :  { %v1004_v2 = vpop.f32.mrf.mxu1 }
 0x611   :  { %v1024_v36 = vadd.f32 %v1004_v2, %v2351_v7  ;;  %v1020_v7 = vadd.f32 %v992_v53, %v2369_v27  ;;  %v1016_v27 = vadd.f32 %v980_v11, %v2385_v38  ;;  %v1013_v38 = vadd.f32 %v2426_v42, %v2397_v30 }
 0x612   :  { %v1010_v42 = vadd.f32 %v2420_v39, %v2410_v24 }
 0x613   :  { %1087 = vmatmul.f32.gmra.mxu2 %v942_v5 }
 0x618   :  { %v1007_v21 = vpop.f32.mrf.mxu1 }
 0x619   :  { %v1025_v25 = vadd.f32 %v1007_v21, %v2346_v13  ;;  %v1021_v13 = vadd.f32 %v995_v55, %v2363_v23  ;;  %v1017_v23 = vadd.f32 %v983_v40, %v2381_v34  ;;  %v1014_v34 = vadd.f32 %v2431_v15, %v2393_v10 }
 0x61a   :  { %v1011_v10 = vadd.f32 %v2422_v43, %v2405_v3 }
 0x61e   :  { %v2428_v28 = vpop.f32.mrf.mxu2 }
 0x61f   :  { %1123 = vmatmul.f32.vlgmr.msra.gmra.mxu3 %v2428_v28  ;;  %v2526_v12 = vadd.f32 %v2428_v28, %v1010_v42 }
 0x626   :  { %v2433_v37 = vpop.f32.mrf.mxu2 }
 0x627   :  { %1126 = vmatmul.f32.gmra.mxu3 %v2433_v37 }
 0x62e   :  { %v2438_v1 = vpop.f32.mrf.mxu2 }
 0x62f   :  { %1129 = vmatmul.f32.gmra.mxu3 %v2438_v1  ;;  %v2516_v15 = vadd.f32 %v2438_v1, %v1012_v20 }
 0x636   :  { %v2441_v44 = vpop.f32.mrf.mxu2 }
 0x637   :  { %1132 = vmatmul.f32.gmra.mxu3 %v2441_v44  ;;  %v2510_v19 = vadd.f32 %v2441_v44, %v1013_v38 }
 0x63e   :  { %v2444_v49 = vpop.f32.mrf.mxu2 }
 0x63f   :  { %1135 = vmatmul.f32.gmra.mxu3 %v2444_v49  ;;  %v2504_v11 = vadd.f32 %v2444_v49, %v1014_v34  ;;  %v2522_v49 = vadd.f32 %v2433_v37, %v1011_v10 }
 0x646   :  { %v2447_v4 = vpop.f32.mrf.mxu2 }
 0x647   :  { %1138 = vmatmul.f32.gmra.mxu3 %v2447_v4  ;;  %v2498_v5 = vadd.f32 %v2447_v4, %v1015_v16 }
 0x64e   :  { %v1061_v61 = vpop.f32.mrf.mxu2 }
 0x64f   :  { %1141 = vmatmul.f32.gmra.mxu3 %v1061_v61  ;;  %v2490_v31 = vadd.f32 %v1061_v61, %v1016_v27 }
 0x656   :  { %v1064_v41 = vpop.f32.mrf.mxu2 }
 0x657   :  { %1144 = vmatmul.f32.gmra.mxu3 %v1064_v41  ;;  %v2485_v46 = vadd.f32 %v1064_v41, %v1017_v23 }
 0x65e   :  { %v1067_v26 = vpop.f32.mrf.mxu2 }
 0x65f   :  { %v2451_v50 = vadd.f32 %v1067_v26, %v1018_v47  ;;  %1147 = vmatmul.f32.gmra.mxu3 %v1067_v26 }
 0x666   :  { %v1070_v54 = vpop.f32.mrf.mxu2 }
 0x667   :  { %1150 = vmatmul.f32.gmra.mxu3 %v1070_v54  ;;  %v2479_v33 = vadd.f32 %v1070_v54, %v1019_v8 }
 0x66e   :  { %v1073_v56 = vpop.f32.mrf.mxu2 }
 0x66f   :  { %1153 = vmatmul.f32.gmra.mxu3 %v1073_v56  ;;  %v2474_v59 = vadd.f32 %v1073_v56, %v1020_v7 }
 0x676   :  { %v1076_v60 = vpop.f32.mrf.mxu2 }
 0x677   :  { %1156 = vmatmul.f32.gmra.mxu3 %v1076_v60  ;;  %v2470_v17 = vadd.f32 %v1076_v60, %v1021_v13 }
 0x67e   :  { %v1079_v63 = vpop.f32.mrf.mxu2 }
 0x67f   :  { %1159 = vmatmul.f32.gmra.mxu3 %v1079_v63  ;;  %v2466_v52 = vadd.f32 %v1079_v63, %v1022_v57 }
 0x686   :  { %v1082_v0 = vpop.f32.mrf.mxu2 }
 0x687   :  { %1162 = vmatmul.f32.gmra.mxu3 %v1082_v0  ;;  %v2462_v14 = vadd.f32 %v1082_v0, %v1023_v18 }
 0x68e   :  { %v1085_v6 = vpop.f32.mrf.mxu2 }
 0x68f   :  { %1165 = vmatmul.f32.gmra.mxu3 %v1085_v6  ;;  %v2458_v32 = vadd.f32 %v1085_v6, %v1024_v36 }
 0x696   :  { %v1088_v45 = vpop.f32.mrf.mxu2 }
 0x697   :  { %v2455_v51 = vadd.f32 %v1088_v45, %v1025_v25  ;;  %1168 = vmatmul.f32.gmra.mxu3 %v1088_v45 }
 0x699   :  { %1172 = vmatpush.msrb.mxu0 %v2455_v51 }
 0x69b   :  { %1173 = vmatpush.msrb.mxu0 %v2458_v32 }
 0x69d   :  { %1174 = vmatpush.msrb.mxu0 %v2462_v14 }
 0x69f   :  { %1175 = vmatpush.msrb.mxu0 %v2466_v52 }
 0x6a1   :  { %1176 = vmatpush.msrb.mxu0 %v2470_v17 }
 0x6a2   :  { %v2477_v22 = vpop.f32.mrf.mxu3 }
 0x6a3   :  { %1177 = vmatpush.msrb.mxu0 %v2474_v59 }
 0x6a5   :  { %1178 = vmatpush.msrb.mxu0 %v2479_v33 }
 0x6a7   :  { %1179 = vmatpush.msrb.mxu0 %v2451_v50 }
 0x6a9   :  { %1180 = vmatpush.msrb.mxu0 %v2485_v46 }
 0x6aa   :  { %v2493_v48 = vpop.f32.mrf.mxu3 }
 0x6ab   :  { %1181 = vmatpush.msrb.mxu0 %v2490_v31 }
 0x6ad   :  { %1182 = vmatpush.msrb.mxu0 %v2498_v5 }
 0x6af   :  { %1183 = vmatpush.msrb.mxu0 %v2504_v11 }
 0x6b1   :  { %1184 = vmatpush.msrb.mxu0 %v2510_v19 }
 0x6b2   :  { %v1130_v30 = vpop.f32.mrf.mxu3 }
 0x6b3   :  { %1185 = vmatpush.msrb.mxu0 %v2516_v15 }
 0x6b5   :  { %1186 = vmatpush.msrb.mxu0 %v2522_v49 }
 0x6b7   :  { %1187 = vmatpush.msrb.mxu0 %v2526_v12 }
 0x6b8   :  { %1188 = vmatmul.f32.vlgmr.msrb.gmra.mxu0 %v2477_v22 }
 0x6ba   :  { %v1133_v3 = vpop.f32.mrf.mxu3 }
 0x6c0   :  { %1191 = vmatmul.f32.gmra.mxu0 %v2493_v48 }
 0x6c2   :  { %v1136_v43 = vpop.f32.mrf.mxu3 }
 0x6c8   :  { %1194 = vmatmul.f32.gmra.mxu0 %v1130_v30 }
 0x6ca   :  { %v1139_v24 = vpop.f32.mrf.mxu3 }
 0x6d0   :  { %1197 = vmatmul.f32.gmra.mxu0 %v1133_v3 }
 0x6d2   :  { %v1142_v39 = vpop.f32.mrf.mxu3 }
 0x6d8   :  { %1200 = vmatmul.f32.gmra.mxu0 %v1136_v43 }
 0x6da   :  { %v1145_v9 = vpop.f32.mrf.mxu3 }
 0x6e0   :  { %1203 = vmatmul.f32.gmra.mxu0 %v1139_v24 }
 0x6e2   :  { %v1148_v37 = vpop.f32.mrf.mxu3 }
 0x6e8   :  { %1206 = vmatmul.f32.gmra.mxu0 %v1142_v39 }
 0x6ea   :  { %v1151_v28 = vpop.f32.mrf.mxu3 }
 0x6f0   :  { %1209 = vmatmul.f32.gmra.mxu0 %v1145_v9 }
 0x6f2   :  { %v1154_v1 = vpop.f32.mrf.mxu3 }
 0x6f8   :  { %1212 = vmatmul.f32.gmra.mxu0 %v1148_v37 }
 0x6fa   :  { %v1157_v44 = vpop.f32.mrf.mxu3 }
 0x700   :  { %1215 = vmatmul.f32.gmra.mxu0 %v1151_v28 }
 0x702   :  { %v1160_v40 = vpop.f32.mrf.mxu3 }
 0x708   :  { %1218 = vmatmul.f32.gmra.mxu0 %v1154_v1 }
 0x70a   :  { %v1163_v4 = vpop.f32.mrf.mxu3 }
 0x710   :  { %1221 = vmatmul.f32.gmra.mxu0 %v1157_v44 }
 0x712   :  { %v1166_v35 = vpop.f32.mrf.mxu3 }
 0x718   :  { %1224 = vmatmul.f32.gmra.mxu0 %v1160_v40 }
 0x71a   :  { %v1169_v61 = vpop.f32.mrf.mxu3 }
 0x71b   :  { %1253 = vmatpush.msrb.mxu1 %v1169_v61 }
 0x71d   :  { %1254 = vmatpush.msrb.mxu1 %v1166_v35 }
 0x71f   :  { %1255 = vmatpush.msrb.mxu1 %v1163_v4 }
 0x720   :  { %1227 = vmatmul.f32.gmra.mxu0 %v1163_v4 }
 0x721   :  { %1256 = vmatpush.msrb.mxu1 %v1160_v40 }
 0x723   :  { %1257 = vmatpush.msrb.mxu1 %v1157_v44 }
 0x725   :  { %1258 = vmatpush.msrb.mxu1 %v1154_v1 }
 0x727   :  { %1259 = vmatpush.msrb.mxu1 %v1151_v28 }
 0x728   :  { %1230 = vmatmul.f32.gmra.mxu0 %v1166_v35 }
 0x729   :  { %1260 = vmatpush.msrb.mxu1 %v1148_v37 }
 0x72b   :  { %1261 = vmatpush.msrb.mxu1 %v1145_v9 }
 0x72d   :  { %1262 = vmatpush.msrb.mxu1 %v1142_v39 }
 0x72f   :  { %1263 = vmatpush.msrb.mxu1 %v1139_v24 }
 0x730   :  { %1233 = vmatmul.f32.gmra.mxu0 %v1169_v61 }
 0x731   :  { %1264 = vmatpush.msrb.mxu1 %v1136_v43 }
 0x733   :  { %1265 = vmatpush.msrb.mxu1 %v1133_v3 }
 0x735   :  { %v2532_v29 = vpop.f32.mrf.mxu0  ;;  %1266 = vmatpush.msrb.mxu1 %v1130_v30 }
 0x736   :  { %v2599_v27 = vadd.f32 %v2532_v29, %v2526_v12 }
 0x737   :  { %1267 = vmatpush.msrb.mxu1 %v2493_v48 }
 0x739   :  { %1268 = vmatpush.msrb.mxu1 %v2477_v22 }
 0x73a   :  { %1269 = vmatmul.f32.vlgmr.msrb.gmra.mxu1 %v2477_v22 }
 0x73d   :  { %v1192_v41 = vpop.f32.mrf.mxu0 }
 0x73e   :  { %v2594_v23 = vadd.f32 %v1192_v41, %v2522_v49 }
 0x742   :  { %1272 = vmatmul.f32.gmra.mxu1 %v2493_v48 }
 0x745   :  { %v1195_v47 = vpop.f32.mrf.mxu0 }
 0x74a   :  { %1275 = vmatmul.f32.gmra.mxu1 %v1130_v30 }
 0x74d   :  { %v1198_v26 = vpop.f32.mrf.mxu0 }
 0x752   :  { %1278 = vmatmul.f32.gmra.mxu1 %v1133_v3 }
 0x755   :  { %v1201_v53 = vpop.f32.mrf.mxu0 }
 0x75a   :  { %1281 = vmatmul.f32.gmra.mxu1 %v1136_v43 }
 0x75d   :  { %v1204_v54 = vpop.f32.mrf.mxu0 }
 0x75e   :  { %v2578_v8 = vadd.f32 %v1204_v54, %v2498_v5 }
 0x762   :  { %1284 = vmatmul.f32.gmra.mxu1 %v1139_v24 }
 0x765   :  { %v1207_v55 = vpop.f32.mrf.mxu0 }
 0x76a   :  { %1287 = vmatmul.f32.gmra.mxu1 %v1142_v39 }
 0x76d   :  { %v1210_v56 = vpop.f32.mrf.mxu0 }
 0x772   :  { %1290 = vmatmul.f32.gmra.mxu1 %v1145_v9 }
 0x775   :  { %v1213_v58 = vpop.f32.mrf.mxu0 }
 0x776   :  { %v2566_v13 = vadd.f32 %v1213_v58, %v2451_v50  ;;  %v2582_v50 = vadd.f32 %v1201_v53, %v2504_v11 }
 0x77a   :  { %1293 = vmatmul.f32.gmra.mxu1 %v1148_v37 }
 0x77d   :  { %v1216_v60 = vpop.f32.mrf.mxu0 }
 0x782   :  { %1296 = vmatmul.f32.gmra.mxu1 %v1151_v28 }
 0x785   :  { %v1219_v62 = vpop.f32.mrf.mxu0 }
 0x78a   :  { %1299 = vmatmul.f32.gmra.mxu1 %v1154_v1 }
 0x78d   :  { %v1222_v63 = vpop.f32.mrf.mxu0 }
 0x78e   :  { %v2554_v57 = vadd.f32 %v1222_v63, %v2470_v17  ;;  %v2574_v17 = vadd.f32 %v1207_v55, %v2490_v31 }
 0x792   :  { %1302 = vmatmul.f32.gmra.mxu1 %v1157_v44 }
 0x795   :  { %v1225_v0 = vpop.f32.mrf.mxu0 }
 0x796   :  { %v2550_v18 = vadd.f32 %v1225_v0, %v2466_v52  ;;  %v2570_v52 = vadd.f32 %v1210_v56, %v2485_v46 }
 0x79a   :  { %1305 = vmatmul.f32.gmra.mxu1 %v1160_v40 }
 0x79d   :  { %v1228_v2 = vpop.f32.mrf.mxu0 }
 0x79e   :  { %v2546_v36 = vadd.f32 %v1228_v2, %v2462_v14  ;;  %v2562_v14 = vadd.f32 %v1216_v60, %v2479_v33  ;;  %v2590_v33 = vadd.f32 %v1195_v47, %v2516_v15 }
 0x7a2   :  { %1308 = vmatmul.f32.gmra.mxu1 %v1163_v4 }
 0x7a5   :  { %v1231_v6 = vpop.f32.mrf.mxu0 }
 0x7a6   :  { %v2542_v45 = vadd.f32 %v1231_v6, %v2458_v32  ;;  %v2558_v32 = vadd.f32 %v1219_v62, %v2474_v59  ;;  %v2586_v59 = vadd.f32 %v1198_v26, %v2510_v19  ;;  %v2650_v6 = vld [vmem:[#allocation19_spill] sm:$0xff] }
 0x7aa   :  { %1311 = vmatmul.f32.gmra.mxu1 %v1166_v35 }
 0x7ad   :  { %v1234_v21 = vpop.f32.mrf.mxu0 }
 0x7ae   :  { %v2539_v25 = vadd.f32 %v1234_v21, %v2455_v51  ;;  %v2651_v21 = vld [vmem:[#allocation18_spill] sm:$0xff] }
 0x7b0   :  { %1318 = vmatpush.msra.mxu2 %v2539_v25 }
 0x7b2   :  { %1314 = vmatmul.f32.gmra.mxu1 %v1169_v61  ;;  %1319 = vmatpush.msra.mxu2 %v2542_v45 }
 0x7b4   :  { %1320 = vmatpush.msra.mxu2 %v2546_v36 }
 0x7b6   :  { %1321 = vmatpush.msra.mxu2 %v2550_v18 }
 0x7b7   :  { %v1270_v51 = vpop.f32.mrf.mxu1 }
 0x7b8   :  { %1322 = vmatpush.msra.mxu2 %v2554_v57 }
 0x7ba   :  { %1323 = vmatpush.msra.mxu2 %v2558_v32 }
 0x7bc   :  { %1324 = vmatpush.msra.mxu2 %v2562_v14 }
 0x7be   :  { %1325 = vmatpush.msra.mxu2 %v2566_v13 }
 0x7bf   :  { %v1273_v7 = vpop.f32.mrf.mxu1 }
 0x7c0   :  { %1326 = vmatpush.msra.mxu2 %v2570_v52 }
 0x7c2   :  { %1327 = vmatpush.msra.mxu2 %v2574_v17 }
 0x7c4   :  { %1328 = vmatpush.msra.mxu2 %v2578_v8 }
 0x7c6   :  { %1329 = vmatpush.msra.mxu2 %v2582_v50 }
 0x7c7   :  { %v1276_v22 = vpop.f32.mrf.mxu1 }
 0x7c8   :  { %1330 = vmatpush.msra.mxu2 %v2586_v59 }
 0x7ca   :  { %1331 = vmatpush.msra.mxu2 %v2590_v33 }
 0x7cc   :  { %1332 = vmatpush.msra.mxu2 %v2594_v23 }
 0x7ce   :  { %1333 = vmatpush.msra.mxu2 %v2599_v27 }
 0x7cf   :  { %v1279_v46 = vpop.f32.mrf.mxu1  ;;  %1334 = vmatmul.f32.vlgmr.msra.gmra.mxu2 %v1270_v51 }
 0x7d7   :  { %1337 = vmatmul.f32.gmra.mxu2 %v1273_v7  ;;  %v1282_v16 = vpop.f32.mrf.mxu1 }
 0x7df   :  { %1340 = vmatmul.f32.gmra.mxu2 %v1276_v22  ;;  %v1285_v31 = vpop.f32.mrf.mxu1 }
 0x7e7   :  { %1343 = vmatmul.f32.gmra.mxu2 %v1279_v46  ;;  %v1288_v48 = vpop.f32.mrf.mxu1 }
 0x7ef   :  { %1346 = vmatmul.f32.gmra.mxu2 %v1282_v16  ;;  %v1291_v34 = vpop.f32.mrf.mxu1 }
 0x7f7   :  { %1349 = vmatmul.f32.gmra.mxu2 %v1285_v31  ;;  %v1294_v5 = vpop.f32.mrf.mxu1 }
 0x7ff   :  { %1352 = vmatmul.f32.gmra.mxu2 %v1288_v48  ;;  %v1297_v38 = vpop.f32.mrf.mxu1 }
 0x807   :  { %1355 = vmatmul.f32.gmra.mxu2 %v1291_v34  ;;  %v1300_v11 = vpop.f32.mrf.mxu1 }
 0x80f   :  { %1358 = vmatmul.f32.gmra.mxu2 %v1294_v5  ;;  %v1303_v20 = vpop.f32.mrf.mxu1 }
 0x817   :  { %1361 = vmatmul.f32.gmra.mxu2 %v1297_v38  ;;  %v1306_v19 = vpop.f32.mrf.mxu1 }
 0x81f   :  { %1364 = vmatmul.f32.gmra.mxu2 %v1300_v11  ;;  %v1309_v10 = vpop.f32.mrf.mxu1 }
 0x827   :  { %1367 = vmatmul.f32.gmra.mxu2 %v1303_v20  ;;  %v1312_v15 = vpop.f32.mrf.mxu1 }
 0x82f   :  { %1370 = vmatmul.f32.gmra.mxu2 %v1306_v19  ;;  %v1315_v30 = vpop.f32.mrf.mxu1 }
 0x837   :  { %1373 = vmatmul.f32.gmra.mxu2 %v1309_v10 }
 0x83f   :  { %1376 = vmatmul.f32.gmra.mxu2 %v1312_v15 }
 0x847   :  { %1379 = vmatmul.f32.gmra.mxu2 %v1315_v30 }
 0x852   :  { %v1335_v42 = vpop.f32.mrf.mxu2 }
 0x85a   :  { %v1338_v49 = vpop.f32.mrf.mxu2 }
 0x862   :  { %v1341_v12 = vpop.f32.mrf.mxu2 }
 0x863   :  { %v1385_v2 = vadd.f32 %v1341_v12, %v2590_v33 }
 0x86a   :  { %v1344_v3 = vpop.f32.mrf.mxu2 }
 0x86b   :  { %v1386_v0 = vadd.f32 %v1344_v3, %v2586_v59 }
 0x872   :  { %v1347_v43 = vpop.f32.mrf.mxu2 }
 0x873   :  { %v1387_v63 = vadd.f32 %v1347_v43, %v2582_v50 }
 0x87a   :  { %v1350_v24 = vpop.f32.mrf.mxu2 }
 0x87b   :  { %v1388_v62 = vadd.f32 %v1350_v24, %v2578_v8 }
 0x882   :  { %v1353_v39 = vpop.f32.mrf.mxu2 }
 0x883   :  { %v1389_v60 = vadd.f32 %v1353_v39, %v2574_v17 }
 0x88a   :  { %v1356_v9 = vpop.f32.mrf.mxu2 }
 0x88b   :  { %v1390_v58 = vadd.f32 %v1356_v9, %v2570_v52 }
 0x892   :  { %v1359_v37 = vpop.f32.mrf.mxu2 }
 0x893   :  { %v1391_v56 = vadd.f32 %v1359_v37, %v2566_v13 }
 0x89a   :  { %v1362_v28 = vpop.f32.mrf.mxu2 }
 0x89b   :  { %v1392_v55 = vadd.f32 %v1362_v28, %v2562_v14 }
 0x8a2   :  { %v1365_v1 = vpop.f32.mrf.mxu2 }
 0x8a3   :  { %v1393_v54 = vadd.f32 %v1365_v1, %v2558_v32 }
 0x8aa   :  { %v1368_v44 = vpop.f32.mrf.mxu2 }
 0x8ab   :  { %v1394_v53 = vadd.f32 %v1368_v44, %v2554_v57 }
 0x8b2   :  { %v1371_v40 = vpop.f32.mrf.mxu2 }
 0x8b3   :  { %v1395_v26 = vadd.f32 %v1371_v40, %v2550_v18 }
 0x8ba   :  { %v1374_v4 = vpop.f32.mrf.mxu2 }
 0x8bb   :  { %v1396_v47 = vadd.f32 %v1374_v4, %v2546_v36  ;;  %v1383_v36 = vadd.f32 %v1335_v42, %v2599_v27 }
 0x8c2   :  { %v1377_v35 = vpop.f32.mrf.mxu2 }
 0x8c3   :  { %v1397_v41 = vadd.f32 %v1377_v35, %v2542_v45  ;;  %v1384_v45 = vadd.f32 %v1338_v49, %v2594_v23 }
 0x8ca   :  { %v1380_v61 = vpop.f32.mrf.mxu2 }
 0x8cb   :  { %v1398_v29 = vadd.f32 %v1380_v61, %v2539_v25  ;;  %v423_v25 = vadd.f32 %v2651_v21, %v2650_v6 }
 0x8cd   :  { %1399 = vmatpush.msrb.mxu3 %v1398_v29  ;;  %v425_v18 = vmul.f32 0.42910594, %v423_v25 }
 0x8cf   :  { %1400 = vmatpush.msrb.mxu3 %v1397_v41 }
 0x8d1   :  { %1401 = vmatpush.msrb.mxu3 %v1396_v47 }
 0x8d3   :  { %1402 = vmatpush.msrb.mxu3 %v1395_v26 }
 0x8d5   :  { %1403 = vmatpush.msrb.mxu3 %v1394_v53 }
 0x8d7   :  { %1404 = vmatpush.msrb.mxu3 %v1393_v54 }
 0x8d9   :  { %1405 = vmatpush.msrb.mxu3 %v1392_v55 }
 0x8db   :  { %1406 = vmatpush.msrb.mxu3 %v1391_v56 }
 0x8dd   :  { %1407 = vmatpush.msrb.mxu3 %v1390_v58 }
 0x8df   :  { %1408 = vmatpush.msrb.mxu3 %v1389_v60 }
 0x8e1   :  { %1409 = vmatpush.msrb.mxu3 %v1388_v62 }
 0x8e3   :  { %1410 = vmatpush.msrb.mxu3 %v1387_v63 }
 0x8e5   :  { %1411 = vmatpush.msrb.mxu3 %v1386_v0 }
 0x8e7   :  { %1412 = vmatpush.msrb.mxu3 %v1385_v2 }
 0x8e9   :  { %1413 = vmatpush.msrb.mxu3 %v1384_v45 }
 0x8eb   :  { %1414 = vmatpush.msrb.mxu3 %v1383_v36 }
 0x8ec   :  { %1415 = vmatmul.f32.vlgmr.msrb.gmra.mxu3 %v425_v18 }
 0x96f   :  { %v1416_v57 = vpop.f32.mrf.mxu3 }
 0x970   :  { %1419 = vst [vmem:[#allocation7] sm:$0xff] %v1416_v57 }
 0x971   :  { %1430 = dma.vmem_to_hbm [thread:$0]  %s1426_s1, 128, %s1428_s23, [#allocation4]  }
 0x972   :  { %1687 = dma.done.wait [#allocation4], 128  }
 0x973   :  { %1688 = vsyncadd [#allocation4], 4294967168 }
 0x974   :  { %1435 = vsyncpa [#allocation3], 1 }
 0x975   :  { %1436 = vsyncpa [#allocation6], 1 }
 0x976   :  { %1437 = vsyncpa [#allocation4], 1 }

</bundles_post_ra>
